<compile_context>
chip_gen: v5e
topology: v5e:2x2
jax: 0.10.0
libtpu: 0.0.40
codegen_flags: <defaults>
</compile_context>

<pallas_src>
import functools

import jax
import jax.numpy as jnp
from jax.experimental import pallas as pl
from jax.experimental.pallas import tpu as pltpu


def _spatial_attention_kernel(x_ref, b_ref, o_ref, pad_ref, *, C, H, W, K):
    """x_ref: (1, C, H, W) VMEM; b_ref: (2, K, W, W) VMEM banded weights;
    o_ref: (1, 1, H, W) VMEM; pad_ref: (2, H + 2p, W) VMEM scratch."""
    p = K // 2

    # ---- 1) channel reduction (mean + max), chunked to bound live vregs ----
    CHUNK = 8  # one sublane group of channels per chunk
    c0 = min(CHUNK, C)
    first = x_ref[0, 0:c0].astype(jnp.float32)            # (c0, H, W)
    run_sum = jnp.sum(first, axis=0)                       # (H, W)
    run_max = jnp.max(first, axis=0)                       # (H, W)
    for start in range(c0, C, CHUNK):
        size = min(CHUNK, C - start)
        chunk = x_ref[0, start:start + size].astype(jnp.float32)
        run_sum = run_sum + jnp.sum(chunk, axis=0)
        run_max = jnp.maximum(run_max, jnp.max(chunk, axis=0))
    avg_map = run_sum * (1.0 / C)                          # == torch.mean(x, 1)
    max_map = run_max                                      # == torch.max(x, 1)

    # ---- 2) row-padded slab; zero the halo rows only once ------------------
    @pl.when(pl.program_id(0) == 0)
    def _init():
        pad_ref[...] = jnp.zeros_like(pad_ref)

    pad_ref[0, p:p + H, :] = avg_map
    pad_ref[1, p:p + H, :] = max_map

    # ---- 3) 7x7 conv as 2*K banded matmuls on the MXU ----------------------
    # acc[h, wo] = sum_{c, ky} (pad[c, ky:ky+H, :] @ B[c, ky])[h, wo]
    # where B[c, ky][wi, wo] = weight[c, ky, wi - wo + p] (0 outside the band),
    # i.e. the kx taps + left/right zero padding are baked into B.
    acc = jnp.zeros((H, W), jnp.float32)
    for ky in range(K):
        a_slab = pad_ref[0, ky:ky + H, :]                  # lane-aligned slice
        m_slab = pad_ref[1, ky:ky + H, :]
        acc = acc + jnp.dot(a_slab, b_ref[0, ky],
                            preferred_element_type=jnp.float32,
                            precision=jax.lax.Precision.HIGHEST)
        acc = acc + jnp.dot(m_slab, b_ref[1, ky],
                            preferred_element_type=jnp.float32,
                            precision=jax.lax.Precision.HIGHEST)

    # ---- 4) sigmoid on the EUP (exp + reciprocal), single store ------------
    out = pl.reciprocal(1.0 + jnp.exp(-acc), approx=False)
    o_ref[0, 0] = out.astype(o_ref.dtype)


def _banded_weights(conv_weight, K, W):
    """Fold the kx axis + zero padding into banded matrices, shape (2, K, W, W).

    bands[c, ky, wi, wo] = weight[0, c, ky, wi - wo + p] when that tap exists,
    else 0, so that (row_slab @ bands[c, ky]) applies the horizontal part of
    the convolution with correct boundary handling.
    """
    p = K // 2
    w = conv_weight.reshape(2, K, K).astype(jnp.float32)
    wi = jnp.arange(W)[:, None]                            # (W, 1)
    wo = jnp.arange(W)[None, :]                            # (1, W)
    kx = wi - wo + p                                       # (W, W)
    valid = (kx >= 0) & (kx < K)
    kx_c = jnp.clip(kx, 0, K - 1)
    return jnp.where(valid[None, None], w[:, :, kx_c], 0.0)  # (2, K, W, W)


def spatial_attention(x, conv_weight, kernel_size=7):
    """x: (N, C, H, W); conv_weight: (1, 2, K, K) (PyTorch OIHW layout)."""
    assert kernel_size in (3, 7)
    N, C, H, W = x.shape
    K = kernel_size
    p = K // 2
    bands = _banded_weights(conv_weight, K, W)

    kernel = functools.partial(_spatial_attention_kernel, C=C, H=H, W=W, K=K)

    # VMEM budget: double-buffered in/out blocks + bands + persistent scratch.
    itemsize = jnp.dtype(x.dtype).itemsize
    in_block = C * H * W * itemsize
    out_block = H * W * itemsize
    bands_bytes = 2 * K * W * W * 4
    scratch_bytes = 2 * (H + 2 * p) * W * 4
    needed = 2 * (in_block + out_block) + 2 * bands_bytes + scratch_bytes
    vmem_limit = int(min(100 * 2**20, max(32 * 2**20, 2 * needed)))

    return pl.pallas_call(
        kernel,
        out_shape=jax.ShapeDtypeStruct((N, 1, H, W), x.dtype),
        grid_spec=pltpu.PrefetchScalarGridSpec(
            num_scalar_prefetch=0,
            grid=(N,),
            in_specs=[
                pl.BlockSpec((1, C, H, W), lambda n: (n, 0, 0, 0)),
                pl.BlockSpec((2, K, W, W), lambda n: (0, 0, 0, 0)),
            ],
            out_specs=pl.BlockSpec((1, 1, H, W), lambda n: (n, 0, 0, 0)),
            scratch_shapes=[
                pltpu.VMEM((2, H + 2 * p, W), jnp.float32),
            ],
        ),
        compiler_params=pltpu.CompilerParams(
            dimension_semantics=("parallel",),
            vmem_limit_bytes=vmem_limit,
        ),
    )(x, bands)


def spatial_attention_reference(x, conv_weight):
    """Pure-JAX reference matching the PyTorch module."""
    avg_out = jnp.mean(x, axis=1, keepdims=True)
    max_out = jnp.max(x, axis=1, keepdims=True)
    cat = jnp.concatenate([avg_out, max_out], axis=1)      # (N, 2, H, W)
    out = jax.lax.conv_general_dilated(
        cat, conv_weight, window_strides=(1, 1),
        padding=[(3, 3), (3, 3)],
        dimension_numbers=("NCHW", "OIHW", "NCHW"),
        precision=jax.lax.Precision.HIGHEST,
    )
    return jax.nn.sigmoid(out)


if __name__ == "__main__":
    key = jax.random.PRNGKey(0)
    kx_key, kw_key = jax.random.split(key)

    N, C, H, W = 2, 4, 16, 16
    K = 7

    x = jax.random.normal(kx_key, (N, C, H, W), dtype=jnp.float32)
    # Deterministic synthetic conv weight, PyTorch shape (out=1, in=2, K, K).
    conv_weight = 0.05 * jax.random.normal(kw_key, (1, 2, K, K), dtype=jnp.float32)

    out = spatial_attention(x, conv_weight, kernel_size=K)
    out = jax.block_until_ready(out)

    ref = spatial_attention_reference(x, conv_weight)
    assert out.shape == (N, 1, H, W), out.shape
    # Tolerance covers possible multi-pass bf16 rounding of f32 MXU matmuls;
    # genuine bugs (wrong tap / boundary handling) show up at >= 1e-2.
    assert jnp.allclose(out, ref, atol=2e-3, rtol=0), (
        f"max abs err = {jnp.max(jnp.abs(out - ref))}"
    )

    print("KERNEL_OK")
</pallas_src>

<mosaic_0001>
module attributes {stable_mosaic.version = 11 : i64} {
  func.func @_spatial_attention_kernel(%arg0: i32, %arg1: memref<1x4x16x16xf32, #tpu.memory_space<vmem>>, %arg2: memref<2x7x16x16xf32, #tpu.memory_space<vmem>>, %arg3: memref<1x1x16x16xf32, #tpu.memory_space<vmem>>, %arg4: memref<2x22x16xf32, #tpu.memory_space<vmem>>) attributes {dimension_semantics = [#tpu.dimension_semantics<parallel>], iteration_bounds = array<i64: 2>, scalar_prefetch = 0 : i64, scratch_operands = 1 : i64, tpu.core_type = #tpu.core_type<tc>, window_params = [{transform_indices = @transform_0, window_bounds = array<i64: 1, 4, 16, 16>}, {pipeline_mode = #tpu.pipeline_mode<synchronous>, transform_indices = @transform_1, window_bounds = array<i64: 2, 7, 16, 16>}, {transform_indices = @transform_2, window_bounds = array<i64: 1, 1, 16, 16>}]} {
    %c0 = arith.constant 0 : index
    %c0_0 = arith.constant 0 : index
    %c0_1 = arith.constant 0 : index
    %c0_2 = arith.constant 0 : index
    %0 = vector.load %arg1[%c0, %c0_0, %c0_1, %c0_2] : memref<1x4x16x16xf32, #tpu.memory_space<vmem>>, vector<1x4x16x16xf32>
    %1 = vector.shape_cast %0 : vector<1x4x16x16xf32> to vector<4x16x16xf32>
    %cst = arith.constant dense<0.000000e+00> : vector<16x16xf32>
    %2 = vector.multi_reduction <add>, %1, %cst [0] : vector<4x16x16xf32> to vector<16x16xf32>
    %cst_3 = arith.constant dense<0xFF800000> : vector<16x16xf32>
    %3 = vector.multi_reduction <maximumf>, %1, %cst_3 [0] : vector<4x16x16xf32> to vector<16x16xf32>
    %cst_4 = arith.constant 2.500000e-01 : f32
    %4 = vector.broadcast %cst_4 : f32 to vector<16x16xf32>
    %5 = arith.mulf %2, %4 : vector<16x16xf32>
    %c0_i32 = arith.constant 0 : i32
    %6 = arith.cmpi eq, %arg0, %c0_i32 : i32
    %7 = arith.extui %6 : i1 to i32
    %c0_i32_5 = arith.constant 0 : i32
    %8 = arith.cmpi ne, %7, %c0_i32_5 : i32
    scf.if %8 {
      %cst_125 = arith.constant 0.000000e+00 : f32
      %109 = vector.broadcast %cst_125 : f32 to vector<2x22x16xf32>
      %c0_126 = arith.constant 0 : index
      %c0_127 = arith.constant 0 : index
      %c0_128 = arith.constant 0 : index
      %110 = vector.load %arg4[%c0_126, %c0_127, %c0_128] : memref<2x22x16xf32, #tpu.memory_space<vmem>>, vector<2x22x16xf32>
      tpu.vector_store %arg4[%c0_126, %c0_127, %c0_128], %109 {strides = array<i32>} : memref<2x22x16xf32, #tpu.memory_space<vmem>>, vector<2x22x16xf32>,
    } else {
    }
    %c0_6 = arith.constant 0 : index
    %c3 = arith.constant 3 : index
    %c0_7 = arith.constant 0 : index
    %9 = vector.load %arg4[%c0_6, %c3, %c0_7] : memref<2x22x16xf32, #tpu.memory_space<vmem>>, vector<1x16x16xf32>
    %10 = vector.shape_cast %9 : vector<1x16x16xf32> to vector<16x16xf32>
    %11 = vector.shape_cast %5 : vector<16x16xf32> to vector<1x16x16xf32>
    tpu.vector_store %arg4[%c0_6, %c3, %c0_7], %11 {strides = array<i32>} : memref<2x22x16xf32, #tpu.memory_space<vmem>>, vector<1x16x16xf32>,
    %c1 = arith.constant 1 : index
    %c3_8 = arith.constant 3 : index
    %c0_9 = arith.constant 0 : index
    %12 = vector.load %arg4[%c1, %c3_8, %c0_9] : memref<2x22x16xf32, #tpu.memory_space<vmem>>, vector<1x16x16xf32>
    %13 = vector.shape_cast %12 : vector<1x16x16xf32> to vector<16x16xf32>
    %14 = vector.shape_cast %3 : vector<16x16xf32> to vector<1x16x16xf32>
    tpu.vector_store %arg4[%c1, %c3_8, %c0_9], %14 {strides = array<i32>} : memref<2x22x16xf32, #tpu.memory_space<vmem>>, vector<1x16x16xf32>,
    %cst_10 = arith.constant 0.000000e+00 : f32
    %15 = vector.broadcast %cst_10 : f32 to vector<16x16xf32>
    %c0_11 = arith.constant 0 : index
    %c0_12 = arith.constant 0 : index
    %c0_13 = arith.constant 0 : index
    %16 = vector.load %arg4[%c0_11, %c0_12, %c0_13] : memref<2x22x16xf32, #tpu.memory_space<vmem>>, vector<1x16x16xf32>
    %17 = vector.shape_cast %16 : vector<1x16x16xf32> to vector<16x16xf32>
    %c1_14 = arith.constant 1 : index
    %c0_15 = arith.constant 0 : index
    %c0_16 = arith.constant 0 : index
    %18 = vector.load %arg4[%c1_14, %c0_15, %c0_16] : memref<2x22x16xf32, #tpu.memory_space<vmem>>, vector<1x16x16xf32>
    %19 = vector.shape_cast %18 : vector<1x16x16xf32> to vector<16x16xf32>
    %c0_17 = arith.constant 0 : index
    %c0_18 = arith.constant 0 : index
    %c0_19 = arith.constant 0 : index
    %c0_20 = arith.constant 0 : index
    %20 = vector.load %arg2[%c0_17, %c0_18, %c0_19, %c0_20] : memref<2x7x16x16xf32, #tpu.memory_space<vmem>>, vector<1x1x16x16xf32>
    %21 = vector.shape_cast %20 : vector<1x1x16x16xf32> to vector<16x16xf32>
    %cst_21 = arith.constant dense<0.000000e+00> : vector<16x16xf32>
    %22 = tpu.matmul %17, %21, %cst_21 {dimension_numbers = #tpu.dot_dimension_numbers<[1], [0], [0], [1], [0, 0, 1, 1], [], []>, precision = #tpu.contract_precision<fp32>} : vector<16x16xf32>, vector<16x16xf32>, vector<16x16xf32> -> vector<16x16xf32>
    %23 = arith.addf %15, %22 : vector<16x16xf32>
    %c1_22 = arith.constant 1 : index
    %c0_23 = arith.constant 0 : index
    %c0_24 = arith.constant 0 : index
    %c0_25 = arith.constant 0 : index
    %24 = vector.load %arg2[%c1_22, %c0_23, %c0_24, %c0_25] : memref<2x7x16x16xf32, #tpu.memory_space<vmem>>, vector<1x1x16x16xf32>
    %25 = vector.shape_cast %24 : vector<1x1x16x16xf32> to vector<16x16xf32>
    %cst_26 = arith.constant dense<0.000000e+00> : vector<16x16xf32>
    %26 = tpu.matmul %19, %25, %cst_26 {dimension_numbers = #tpu.dot_dimension_numbers<[1], [0], [0], [1], [0, 0, 1, 1], [], []>, precision = #tpu.contract_precision<fp32>} : vector<16x16xf32>, vector<16x16xf32>, vector<16x16xf32> -> vector<16x16xf32>
    %27 = arith.addf %23, %26 : vector<16x16xf32>
    %c0_27 = arith.constant 0 : index
    %c1_28 = arith.constant 1 : index
    %c0_29 = arith.constant 0 : index
    %28 = vector.load %arg4[%c0_27, %c1_28, %c0_29] : memref<2x22x16xf32, #tpu.memory_space<vmem>>, vector<1x16x16xf32>
    %29 = vector.shape_cast %28 : vector<1x16x16xf32> to vector<16x16xf32>
    %c1_30 = arith.constant 1 : index
    %c1_31 = arith.constant 1 : index
    %c0_32 = arith.constant 0 : index
    %30 = vector.load %arg4[%c1_30, %c1_31, %c0_32] : memref<2x22x16xf32, #tpu.memory_space<vmem>>, vector<1x16x16xf32>
    %31 = vector.shape_cast %30 : vector<1x16x16xf32> to vector<16x16xf32>
    %c0_33 = arith.constant 0 : index
    %c1_34 = arith.constant 1 : index
    %c0_35 = arith.constant 0 : index
    %c0_36 = arith.constant 0 : index
    %32 = vector.load %arg2[%c0_33, %c1_34, %c0_35, %c0_36] : memref<2x7x16x16xf32, #tpu.memory_space<vmem>>, vector<1x1x16x16xf32>
    %33 = vector.shape_cast %32 : vector<1x1x16x16xf32> to vector<16x16xf32>
    %cst_37 = arith.constant dense<0.000000e+00> : vector<16x16xf32>
    %34 = tpu.matmul %29, %33, %cst_37 {dimension_numbers = #tpu.dot_dimension_numbers<[1], [0], [0], [1], [0, 0, 1, 1], [], []>, precision = #tpu.contract_precision<fp32>} : vector<16x16xf32>, vector<16x16xf32>, vector<16x16xf32> -> vector<16x16xf32>
    %35 = arith.addf %27, %34 : vector<16x16xf32>
    %c1_38 = arith.constant 1 : index
    %c1_39 = arith.constant 1 : index
    %c0_40 = arith.constant 0 : index
    %c0_41 = arith.constant 0 : index
    %36 = vector.load %arg2[%c1_38, %c1_39, %c0_40, %c0_41] : memref<2x7x16x16xf32, #tpu.memory_space<vmem>>, vector<1x1x16x16xf32>
    %37 = vector.shape_cast %36 : vector<1x1x16x16xf32> to vector<16x16xf32>
    %cst_42 = arith.constant dense<0.000000e+00> : vector<16x16xf32>
    %38 = tpu.matmul %31, %37, %cst_42 {dimension_numbers = #tpu.dot_dimension_numbers<[1], [0], [0], [1], [0, 0, 1, 1], [], []>, precision = #tpu.contract_precision<fp32>} : vector<16x16xf32>, vector<16x16xf32>, vector<16x16xf32> -> vector<16x16xf32>
    %39 = arith.addf %35, %38 : vector<16x16xf32>
    %c0_43 = arith.constant 0 : index
    %c2 = arith.constant 2 : index
    %c0_44 = arith.constant 0 : index
    %40 = vector.load %arg4[%c0_43, %c2, %c0_44] : memref<2x22x16xf32, #tpu.memory_space<vmem>>, vector<1x16x16xf32>
    %41 = vector.shape_cast %40 : vector<1x16x16xf32> to vector<16x16xf32>
    %c1_45 = arith.constant 1 : index
    %c2_46 = arith.constant 2 : index
    %c0_47 = arith.constant 0 : index
    %42 = vector.load %arg4[%c1_45, %c2_46, %c0_47] : memref<2x22x16xf32, #tpu.memory_space<vmem>>, vector<1x16x16xf32>
    %43 = vector.shape_cast %42 : vector<1x16x16xf32> to vector<16x16xf32>
    %c0_48 = arith.constant 0 : index
    %c2_49 = arith.constant 2 : index
    %c0_50 = arith.constant 0 : index
    %c0_51 = arith.constant 0 : index
    %44 = vector.load %arg2[%c0_48, %c2_49, %c0_50, %c0_51] : memref<2x7x16x16xf32, #tpu.memory_space<vmem>>, vector<1x1x16x16xf32>
    %45 = vector.shape_cast %44 : vector<1x1x16x16xf32> to vector<16x16xf32>
    %cst_52 = arith.constant dense<0.000000e+00> : vector<16x16xf32>
    %46 = tpu.matmul %41, %45, %cst_52 {dimension_numbers = #tpu.dot_dimension_numbers<[1], [0], [0], [1], [0, 0, 1, 1], [], []>, precision = #tpu.contract_precision<fp32>} : vector<16x16xf32>, vector<16x16xf32>, vector<16x16xf32> -> vector<16x16xf32>
    %47 = arith.addf %39, %46 : vector<16x16xf32>
    %c1_53 = arith.constant 1 : index
    %c2_54 = arith.constant 2 : index
    %c0_55 = arith.constant 0 : index
    %c0_56 = arith.constant 0 : index
    %48 = vector.load %arg2[%c1_53, %c2_54, %c0_55, %c0_56] : memref<2x7x16x16xf32, #tpu.memory_space<vmem>>, vector<1x1x16x16xf32>
    %49 = vector.shape_cast %48 : vector<1x1x16x16xf32> to vector<16x16xf32>
    %cst_57 = arith.constant dense<0.000000e+00> : vector<16x16xf32>
    %50 = tpu.matmul %43, %49, %cst_57 {dimension_numbers = #tpu.dot_dimension_numbers<[1], [0], [0], [1], [0, 0, 1, 1], [], []>, precision = #tpu.contract_precision<fp32>} : vector<16x16xf32>, vector<16x16xf32>, vector<16x16xf32> -> vector<16x16xf32>
    %51 = arith.addf %47, %50 : vector<16x16xf32>
    %c0_58 = arith.constant 0 : index
    %c3_59 = arith.constant 3 : index
    %c0_60 = arith.constant 0 : index
    %52 = vector.load %arg4[%c0_58, %c3_59, %c0_60] : memref<2x22x16xf32, #tpu.memory_space<vmem>>, vector<1x16x16xf32>
    %53 = vector.shape_cast %52 : vector<1x16x16xf32> to vector<16x16xf32>
    %c1_61 = arith.constant 1 : index
    %c3_62 = arith.constant 3 : index
    %c0_63 = arith.constant 0 : index
    %54 = vector.load %arg4[%c1_61, %c3_62, %c0_63] : memref<2x22x16xf32, #tpu.memory_space<vmem>>, vector<1x16x16xf32>
    %55 = vector.shape_cast %54 : vector<1x16x16xf32> to vector<16x16xf32>
    %c0_64 = arith.constant 0 : index
    %c3_65 = arith.constant 3 : index
    %c0_66 = arith.constant 0 : index
    %c0_67 = arith.constant 0 : index
    %56 = vector.load %arg2[%c0_64, %c3_65, %c0_66, %c0_67] : memref<2x7x16x16xf32, #tpu.memory_space<vmem>>, vector<1x1x16x16xf32>
    %57 = vector.shape_cast %56 : vector<1x1x16x16xf32> to vector<16x16xf32>
    %cst_68 = arith.constant dense<0.000000e+00> : vector<16x16xf32>
    %58 = tpu.matmul %53, %57, %cst_68 {dimension_numbers = #tpu.dot_dimension_numbers<[1], [0], [0], [1], [0, 0, 1, 1], [], []>, precision = #tpu.contract_precision<fp32>} : vector<16x16xf32>, vector<16x16xf32>, vector<16x16xf32> -> vector<16x16xf32>
    %59 = arith.addf %51, %58 : vector<16x16xf32>
    %c1_69 = arith.constant 1 : index
    %c3_70 = arith.constant 3 : index
    %c0_71 = arith.constant 0 : index
    %c0_72 = arith.constant 0 : index
    %60 = vector.load %arg2[%c1_69, %c3_70, %c0_71, %c0_72] : memref<2x7x16x16xf32, #tpu.memory_space<vmem>>, vector<1x1x16x16xf32>
    %61 = vector.shape_cast %60 : vector<1x1x16x16xf32> to vector<16x16xf32>
    %cst_73 = arith.constant dense<0.000000e+00> : vector<16x16xf32>
    %62 = tpu.matmul %55, %61, %cst_73 {dimension_numbers = #tpu.dot_dimension_numbers<[1], [0], [0], [1], [0, 0, 1, 1], [], []>, precision = #tpu.contract_precision<fp32>} : vector<16x16xf32>, vector<16x16xf32>, vector<16x16xf32> -> vector<16x16xf32>
    %63 = arith.addf %59, %62 : vector<16x16xf32>
    %c0_74 = arith.constant 0 : index
    %c4 = arith.constant 4 : index
    %c0_75 = arith.constant 0 : index
    %64 = vector.load %arg4[%c0_74, %c4, %c0_75] : memref<2x22x16xf32, #tpu.memory_space<vmem>>, vector<1x16x16xf32>
    %65 = vector.shape_cast %64 : vector<1x16x16xf32> to vector<16x16xf32>
    %c1_76 = arith.constant 1 : index
    %c4_77 = arith.constant 4 : index
    %c0_78 = arith.constant 0 : index
    %66 = vector.load %arg4[%c1_76, %c4_77, %c0_78] : memref<2x22x16xf32, #tpu.memory_space<vmem>>, vector<1x16x16xf32>
    %67 = vector.shape_cast %66 : vector<1x16x16xf32> to vector<16x16xf32>
    %c0_79 = arith.constant 0 : index
    %c4_80 = arith.constant 4 : index
    %c0_81 = arith.constant 0 : index
    %c0_82 = arith.constant 0 : index
    %68 = vector.load %arg2[%c0_79, %c4_80, %c0_81, %c0_82] : memref<2x7x16x16xf32, #tpu.memory_space<vmem>>, vector<1x1x16x16xf32>
    %69 = vector.shape_cast %68 : vector<1x1x16x16xf32> to vector<16x16xf32>
    %cst_83 = arith.constant dense<0.000000e+00> : vector<16x16xf32>
    %70 = tpu.matmul %65, %69, %cst_83 {dimension_numbers = #tpu.dot_dimension_numbers<[1], [0], [0], [1], [0, 0, 1, 1], [], []>, precision = #tpu.contract_precision<fp32>} : vector<16x16xf32>, vector<16x16xf32>, vector<16x16xf32> -> vector<16x16xf32>
    %71 = arith.addf %63, %70 : vector<16x16xf32>
    %c1_84 = arith.constant 1 : index
    %c4_85 = arith.constant 4 : index
    %c0_86 = arith.constant 0 : index
    %c0_87 = arith.constant 0 : index
    %72 = vector.load %arg2[%c1_84, %c4_85, %c0_86, %c0_87] : memref<2x7x16x16xf32, #tpu.memory_space<vmem>>, vector<1x1x16x16xf32>
    %73 = vector.shape_cast %72 : vector<1x1x16x16xf32> to vector<16x16xf32>
    %cst_88 = arith.constant dense<0.000000e+00> : vector<16x16xf32>
    %74 = tpu.matmul %67, %73, %cst_88 {dimension_numbers = #tpu.dot_dimension_numbers<[1], [0], [0], [1], [0, 0, 1, 1], [], []>, precision = #tpu.contract_precision<fp32>} : vector<16x16xf32>, vector<16x16xf32>, vector<16x16xf32> -> vector<16x16xf32>
    %75 = arith.addf %71, %74 : vector<16x16xf32>
    %c0_89 = arith.constant 0 : index
    %c5 = arith.constant 5 : index
    %c0_90 = arith.constant 0 : index
    %76 = vector.load %arg4[%c0_89, %c5, %c0_90] : memref<2x22x16xf32, #tpu.memory_space<vmem>>, vector<1x16x16xf32>
    %77 = vector.shape_cast %76 : vector<1x16x16xf32> to vector<16x16xf32>
    %c1_91 = arith.constant 1 : index
    %c5_92 = arith.constant 5 : index
    %c0_93 = arith.constant 0 : index
    %78 = vector.load %arg4[%c1_91, %c5_92, %c0_93] : memref<2x22x16xf32, #tpu.memory_space<vmem>>, vector<1x16x16xf32>
    %79 = vector.shape_cast %78 : vector<1x16x16xf32> to vector<16x16xf32>
    %c0_94 = arith.constant 0 : index
    %c5_95 = arith.constant 5 : index
    %c0_96 = arith.constant 0 : index
    %c0_97 = arith.constant 0 : index
    %80 = vector.load %arg2[%c0_94, %c5_95, %c0_96, %c0_97] : memref<2x7x16x16xf32, #tpu.memory_space<vmem>>, vector<1x1x16x16xf32>
    %81 = vector.shape_cast %80 : vector<1x1x16x16xf32> to vector<16x16xf32>
    %cst_98 = arith.constant dense<0.000000e+00> : vector<16x16xf32>
    %82 = tpu.matmul %77, %81, %cst_98 {dimension_numbers = #tpu.dot_dimension_numbers<[1], [0], [0], [1], [0, 0, 1, 1], [], []>, precision = #tpu.contract_precision<fp32>} : vector<16x16xf32>, vector<16x16xf32>, vector<16x16xf32> -> vector<16x16xf32>
    %83 = arith.addf %75, %82 : vector<16x16xf32>
    %c1_99 = arith.constant 1 : index
    %c5_100 = arith.constant 5 : index
    %c0_101 = arith.constant 0 : index
    %c0_102 = arith.constant 0 : index
    %84 = vector.load %arg2[%c1_99, %c5_100, %c0_101, %c0_102] : memref<2x7x16x16xf32, #tpu.memory_space<vmem>>, vector<1x1x16x16xf32>
    %85 = vector.shape_cast %84 : vector<1x1x16x16xf32> to vector<16x16xf32>
    %cst_103 = arith.constant dense<0.000000e+00> : vector<16x16xf32>
    %86 = tpu.matmul %79, %85, %cst_103 {dimension_numbers = #tpu.dot_dimension_numbers<[1], [0], [0], [1], [0, 0, 1, 1], [], []>, precision = #tpu.contract_precision<fp32>} : vector<16x16xf32>, vector<16x16xf32>, vector<16x16xf32> -> vector<16x16xf32>
    %87 = arith.addf %83, %86 : vector<16x16xf32>
    %c0_104 = arith.constant 0 : index
    %c6 = arith.constant 6 : index
    %c0_105 = arith.constant 0 : index
    %88 = vector.load %arg4[%c0_104, %c6, %c0_105] : memref<2x22x16xf32, #tpu.memory_space<vmem>>, vector<1x16x16xf32>
    %89 = vector.shape_cast %88 : vector<1x16x16xf32> to vector<16x16xf32>
    %c1_106 = arith.constant 1 : index
    %c6_107 = arith.constant 6 : index
    %c0_108 = arith.constant 0 : index
    %90 = vector.load %arg4[%c1_106, %c6_107, %c0_108] : memref<2x22x16xf32, #tpu.memory_space<vmem>>, vector<1x16x16xf32>
    %91 = vector.shape_cast %90 : vector<1x16x16xf32> to vector<16x16xf32>
    %c0_109 = arith.constant 0 : index
    %c6_110 = arith.constant 6 : index
    %c0_111 = arith.constant 0 : index
    %c0_112 = arith.constant 0 : index
    %92 = vector.load %arg2[%c0_109, %c6_110, %c0_111, %c0_112] : memref<2x7x16x16xf32, #tpu.memory_space<vmem>>, vector<1x1x16x16xf32>
    %93 = vector.shape_cast %92 : vector<1x1x16x16xf32> to vector<16x16xf32>
    %cst_113 = arith.constant dense<0.000000e+00> : vector<16x16xf32>
    %94 = tpu.matmul %89, %93, %cst_113 {dimension_numbers = #tpu.dot_dimension_numbers<[1], [0], [0], [1], [0, 0, 1, 1], [], []>, precision = #tpu.contract_precision<fp32>} : vector<16x16xf32>, vector<16x16xf32>, vector<16x16xf32> -> vector<16x16xf32>
    %95 = arith.addf %87, %94 : vector<16x16xf32>
    %c1_114 = arith.constant 1 : index
    %c6_115 = arith.constant 6 : index
    %c0_116 = arith.constant 0 : index
    %c0_117 = arith.constant 0 : index
    %96 = vector.load %arg2[%c1_114, %c6_115, %c0_116, %c0_117] : memref<2x7x16x16xf32, #tpu.memory_space<vmem>>, vector<1x1x16x16xf32>
    %97 = vector.shape_cast %96 : vector<1x1x16x16xf32> to vector<16x16xf32>
    %cst_118 = arith.constant dense<0.000000e+00> : vector<16x16xf32>
    %98 = tpu.matmul %91, %97, %cst_118 {dimension_numbers = #tpu.dot_dimension_numbers<[1], [0], [0], [1], [0, 0, 1, 1], [], []>, precision = #tpu.contract_precision<fp32>} : vector<16x16xf32>, vector<16x16xf32>, vector<16x16xf32> -> vector<16x16xf32>
    %99 = arith.addf %95, %98 : vector<16x16xf32>
    %cst_119 = arith.constant 0.000000e+00 : f32
    %100 = vector.broadcast %cst_119 : f32 to vector<16x16xf32>
    %101 = arith.subf %100, %99 : vector<16x16xf32>
    %102 = math.exp %101 : vector<16x16xf32>
    %cst_120 = arith.constant 1.000000e+00 : f32
    %103 = vector.broadcast %cst_120 : f32 to vector<16x16xf32>
    %104 = arith.addf %103, %102 : vector<16x16xf32>
    %105 = tpu.reciprocal %104 : vector<16x16xf32> -> vector<16x16xf32>
    %c0_121 = arith.constant 0 : index
    %c0_122 = arith.constant 0 : index
    %c0_123 = arith.constant 0 : index
    %c0_124 = arith.constant 0 : index
    %106 = vector.load %arg3[%c0_121, %c0_122, %c0_123, %c0_124] : memref<1x1x16x16xf32, #tpu.memory_space<vmem>>, vector<1x1x16x16xf32>
    %107 = vector.shape_cast %106 : vector<1x1x16x16xf32> to vector<16x16xf32>
    %108 = vector.shape_cast %105 : vector<16x16xf32> to vector<1x1x16x16xf32>
    tpu.vector_store %arg3[%c0_121, %c0_122, %c0_123, %c0_124], %108 {strides = array<i32>} : memref<1x1x16x16xf32, #tpu.memory_space<vmem>>, vector<1x1x16x16xf32>,
    return
  }
  func.func @transform_0(%arg0: i32) -> (i32, i32, i32, i32) {
    %c0_i32 = arith.constant 0 : i32
    %c0_i32_0 = arith.constant 0 : i32
    %c0_i32_1 = arith.constant 0 : i32
    %c0_i32_2 = arith.constant 0 : i32
    return %arg0, %c0_i32, %c0_i32_0, %c0_i32_1 : i32, i32, i32, i32
  }
  func.func @transform_1(%arg0: i32) -> (i32, i32, i32, i32) {
    %c0_i32 = arith.constant 0 : i32
    %c0_i32_0 = arith.constant 0 : i32
    %c0_i32_1 = arith.constant 0 : i32
    %c0_i32_2 = arith.constant 0 : i32
    %c0_i32_3 = arith.constant 0 : i32
    return %c0_i32, %c0_i32_0, %c0_i32_1, %c0_i32_2 : i32, i32, i32, i32
  }
  func.func @transform_2(%arg0: i32) -> (i32, i32, i32, i32) {
    %c0_i32 = arith.constant 0 : i32
    %c0_i32_0 = arith.constant 0 : i32
    %c0_i32_1 = arith.constant 0 : i32
    %c0_i32_2 = arith.constant 0 : i32
    return %arg0, %c0_i32, %c0_i32_0, %c0_i32_1 : i32, i32, i32, i32
  }
}

</mosaic_0001>

<bundles_post_ra>
// kernel: tpu_custom_call.1
= control target key start
LH: loop header
LB: loop body
LE: loop exit
PB: predicated region body
PF: predicated region fallthrough
CT: control target
= control target key end

     0   :  { %7 = vsyncpa [#allocation4], 0  ;;  %s4209_s0 = inlined_call_operand.hbm [shape: f32[2,4,16,16], index: 0, kind: input, shape index: {}]   ;;  %s4210_s1 = inlined_call_operand.hbm [shape: f32[2,7,16,16], index: 1, kind: input, shape index: {}]   ;;  %s4211_s2 = inlined_call_operand.hbm [shape: f32[2,1,16,16], index: 2, kind: output, shape index: {}]  }
   0x1   :  { %9 = vsyncpa [#allocation4 + $0x1], 0 }
   0x2   :  { %10 = vsyncpa [#allocation7], 0 }
   0x3   :  { %11 = vsyncpa [#allocation5], 0 }
   0x4   :  { %13 = vsyncpa [#allocation5 + $0x1], 0  ;;  %s3452_s9 = smov 0   ;;  %s3454_s10 = smov 0  }
   0x5   :  { %s3456_s11 = smov 0   ;;  %s3458_s12 = smov 0  }
   0x6 LB: > { %s3473_s13 = sadd.s32 4294967295, %s3429_s12   ;;  %s3210_s14 = sadd.s32 4294967294, %s3429_s12   ;;  %s3429_s12 = sphi %s3458_s12, %s4222_s12   ;;  %s3425_s11 = sphi %s3456_s11, %s4221_s11   ;;  %s3421_s10 = sphi %s3454_s10, %s4220_s10   ;;  %s3417_s9 = sphi %s3452_s9, %s4219_s9  }
   0x7   : > { %p39_p0 = scmp.ne.s32.totalorder %s3421_s10, %s3417_s9  ;;  %p40_p1 = scmp.eq.s32.totalorder %s3473_s13, 0 }
   0x8   : > { %p84_p2 = scmp.eq.s32.totalorder %s3473_s13, 1  ;;  %p90_p3 = scmp.eq.s32.totalorder %s3210_s14, 1 }
   0x9   : > { %p3482_p4 = por %p40_p1, %p39_p0  ;;  %p3211_p5 = scmp.ge.s32.totalorder %s3429_s12, 1 }
   0xa   : > { %p3487_p6 = por %p90_p3, %p39_p0  ;;  %p97_p7 = scmp.lt.s32.totalorder %s3429_s12, 3 }
   0xb   : > { %s108_s19 = sshll.u32 %s4210_s1, 4  ;;  %s3431_s21 = smov [#allocation6]   ;;  %s109_s19 = int_to_ptr.hbm [resolvable:$true] %s108_s19 }
   0xc   : > { %p3496_p9 = pnand %p3211_p5, %p97_p7  ;;  %s110_s22 = sshll.u32 %s3431_s21, 4  ;;  %s111_s22 = int_to_ptr.vmem [resolvable:$true] %s110_s22 }
   0xd   : > { %s3506_s23 = sadd.s32 1, %s3429_s12   ;;  %s3432_s24 = smov 128  }
   0xe   : > { %p3237_p10 = pneg %p3496_p9  ;;  %s3433_s25 = smov 8  }
   0xf   : > { %s23_s26 = ssub.s32 %s3429_s12, %s3506_s23  ;;  %s26_s27 = sadd.s32 1, %s3425_s11 }
  0x10   : > { %p3238_p11 = pnand %p3237_p10, %p40_p1  ;;  %p24_p13 = scmp.eq.s32.totalorder %s23_s26, 0 }
  0x11   : > { %p33_p0 = scmp.ne.s32.totalorder %s3425_s11, %s3421_s10  ;;  %p34_p3 = scmp.eq.s32.totalorder %s3429_s12, 0 }
  0x12   : > { %3240 = dma.hbm_to_vmem [thread:$0]  (!%p3238_p11), %s109_s19, 3584, %s111_s22, [#allocation7], %s3432_s24, %s3432_s24, %s3433_s25  }
  0x13   : > { %s3518_s28 = scalar_select %p24_p13, %s3425_s11, %s26_s27  }
  0x14   : > { %p3522_p5 = por %p84_p2, %p33_p0  ;;  %p3250_p7 = scmp.lt.s32.totalorder %s3429_s12, 2 }
  0x15   : > { %s124_s30 = sand.u32 1, %s3425_s11   ;;  %s3227_s3 = sshll.u32 %s3429_s12, 6 }
  0x16   : > { %p35_p10 = por %p34_p3, %p33_p0  ;;  %s3214_s4 = sshll.u32 %s124_s30, 6 }
  0x17   : > { %s133_s7 = scalar_lea.hbm %s4209_s0, %s3227_s3  ;;  %s128_s14 = scalar_lea.vmem [#allocation3], %s3214_s4 }
  0x18   : > { %s134_s8 = sshll.u32 %s133_s7, 4  ;;  %s136_s17 = sshll.u32 %s128_s14, 4  ;;  %s135_s8 = int_to_ptr.hbm [resolvable:$true] %s134_s8  ;;  %s137_s17 = int_to_ptr.vmem [resolvable:$true] %s136_s17 }
  0x19   : > { %p3532_p11 = pnand %p3250_p7, %p35_p10  ;;  %s125_s19 = scalar_lea.sflag [#allocation4], %s124_s30 }
  0x1a   : > { %s3329_s21 = sshra.s32 %s135_s8, 4  ;;  %s3336_s3 = scalar_lea.hbm %s4209_s0, 128  ;;  %s3330_s21 = int_to_ptr.hbm [resolvable:$true] %s3329_s21 }
  0x1b   : > { %s3331_s22 = scalar_lea.hbm %s3330_s21, 64  ;;  %p3333_p13 = pneg %p3532_p11 }
  0x1c   : > { %p3332_p2 = scmp.ne.s32.totalorder %s3330_s21, %s3331_s22  ;;  %p3337_p7 = scmp.lt.s32.totalorder %s3330_s21, %s4209_s0 }
  0x1d   : > { %p3338_p10 = scmp.lt.s32.totalorder %s3336_s3, %s3331_s22 }
  0x1e   : > { %p3334_p0 = pnand %p3333_p13, %p3332_p2 }
  0x1f   : > { %p3339_p12 = por %p3338_p10, %p3337_p7 }
  0x20   : > { %p3335_p3 = pneg %p3334_p0 }
  0x22   : > { %p3340_p8 = pnand %p3339_p12, %p3335_p3 }
  0x24   : > { %3343 = shalt.err (!%p3340_p8)
}
  0x25   : > { %3244 = dma.hbm_to_vmem [thread:$0]  (!%p3532_p11), %s135_s8, 1024, %s137_s17, %s125_s19, %s3432_s24, %s3432_s24, %s3433_s25  }
  0x26   : > { %148 = sbr.rel (%p3496_p9) target bundleno = 581 (0x245), region = 28  ;;  %s3552_s30 = sand.u32 (!%p3496_p9), 1, %s3421_s10  }
  0x27   : > { %s3218_s6 = sshll.u32 (!%p3496_p9), %s3552_s30, 6  ;;  %s151_s7 = scalar_lea.sflag (!%p3496_p9), [#allocation4], %s3552_s30 }
  0x28   : > { %s154_s14 = scalar_lea.vmem (!%p3496_p9), [#allocation3], %s3218_s6 }
  0x2b   : > { %3404 = dma.done.wait (%p3482_p4), %s151_s7, 1024  }
  0x2c   : > { %3406 = vsyncadd (%p3482_p4), %s151_s7, 4294966272 }
  0x2d   : > { %3408 = dma.done.wait (%p40_p1), [#allocation7], 3584  }
  0x2e   : > { %3410 = vsyncadd (%p40_p1), [#allocation7], 4294963712  ;;  %s3220_s20 = sshll.u32 %s3552_s30, 4  ;;  %vm189_vm0 = vcmask 130048   ;;  %v181_v0 = vld [vmem:[%s154_s14] sm:$0xff]  ;;  %v182_v1 = vld [vmem:[%s154_s14 + $0x8] sm:$0xff] }
  0x2f   : > { %v183_v2 = vld [vmem:[%s154_s14 + $0x10] sm:$0xff]  ;;  %v184_v3 = vld [vmem:[%s154_s14 + $0x18] sm:$0xff]  ;;  %v185_v4 = vld [vmem:[%s154_s14 + $0x20] sm:$0xff]  ;;  %v190_v6 = vsel %vm189_vm0, %v181_v0, 0.0  ;;  %v197_v8 = vsel %vm189_vm0, %v182_v1, 0.0  ;;  %v204_v18 = vsel %vm189_vm0, %v181_v0, -inf }
  0x30   : > { %v186_v5 = vld [vmem:[%s154_s14 + $0x28] sm:$0xff]  ;;  %v191_v7 = vsel %vm189_vm0, %v183_v2, 0.0  ;;  %v187_v9 = vld [vmem:[%s154_s14 + $0x30] sm:$0xff]  ;;  %v188_v10 = vld [vmem:[%s154_s14 + $0x38] sm:$0xff]  ;;  %v193_v12 = vsel %vm189_vm0, %v185_v4, 0.0  ;;  %v198_v13 = vsel %vm189_vm0, %v184_v3, 0.0 }
  0x31   : > { %v192_v11 = vadd.f32 %v191_v7, %v190_v6  ;;  %v200_v14 = vsel %vm189_vm0, %v186_v5, 0.0  ;;  %v195_v15 = vsel %vm189_vm0, %v187_v9, 0.0  ;;  %v199_v16 = vadd.f32 %v198_v13, %v197_v8  ;;  %s3583_s15 = scalar_lea.vmem [#allocation8], %s3220_s20  ;;  %p4217_p1 = scmp.ne.s32.totalorder %s3473_s13, 0 }
  0x32   : > { %v202_v17 = vsel %vm189_vm0, %v188_v10, 0.0  ;;  %v205_v20 = vsel %vm189_vm0, %v183_v2, -inf  ;;  %v206_v21 = vsel %vm189_vm0, %v185_v4, -inf  ;;  %v208_v22 = vsel %vm189_vm0, %v187_v9, -inf }
  0x33   : > { %v194_v19 = vadd.f32 %v193_v12, %v192_v11  ;;  %v201_v23 = vadd.f32 %v200_v14, %v199_v16  ;;  %v207_v24 = vmax.f32 %v204_v18, %v206_v21  ;;  %v209_v25 = vmax.f32 %v205_v20, %v208_v22 }
  0x34   : > { %v211_v26 = vsel %vm189_vm0, %v182_v1, -inf  ;;  %v212_v28 = vsel %vm189_vm0, %v184_v3, -inf  ;;  %v213_v29 = vsel %vm189_vm0, %v186_v5, -inf  ;;  %v215_v30 = vsel %vm189_vm0, %v188_v10, -inf  ;;  %223 = sbr.rel (%p4217_p1) target bundleno = 64 (0x40), region = 40 }
  0x35   : > { %v196_v27 = vadd.f32 %v195_v15, %v194_v19  ;;  %v203_v31 = vadd.f32 %v202_v17, %v201_v23  ;;  %v210_v32 = vmax.f32 %v207_v24, %v209_v25  ;;  %v214_v33 = vmax.f32 %v211_v26, %v213_v29 }
  0x36   : > { %v216_v34 = vmax.f32 %v212_v28, %v215_v30 }
  0x37   : > { %v218_v35 = vmul.f32 0.25, %v196_v27  ;;  %v219_v37 = vmul.f32 0.25, %v203_v31 }
  0x38   : > { %v217_v36 = vmax.f32 %v214_v33, %v216_v34 }
  0x39   : > { %v3434_v38 = vmov 0.0   ;;  %vm226_vm1 = vcmask 128000  }
  0x3a   : > { %224 = vst.msk [vmem:[#allocation2] sm:$0xff] %vm189_vm0, %v3434_v38 }
  0x3b   : > { %225 = vst.msk [vmem:[#allocation2 + $0x8] sm:$0xff] %vm189_vm0, %v3434_v38 }
  0x3c   : > { %228 = vst.msk [vmem:[#allocation2 + $0x18] sm:$0xff] %vm189_vm0, %v3434_v38 }
  0x3d   : > { %229 = vst.msk [vmem:[#allocation2 + $0x20] sm:$0xff] %vm189_vm0, %v3434_v38 }
  0x3e   : > { %227 = vst.msk [vmem:[#allocation2 + $0x10] sm:$0x3f] %vm226_vm1, %v3434_v38 }
  0x3f   : > { %230 = vst.msk [vmem:[#allocation2 + $0x28] sm:$0x3f] %vm226_vm1, %v3434_v38 }
  0x40 PF: > { %v244_v39 = vld [vmem:[#allocation6 + $0x78] sm:$0xff]  ;;  %v243_v40 = vld [vmem:[#allocation6 + $0x70] sm:$0xff]  ;;  %234 = vst.msk [vmem:[#allocation2 + $0x1b] sm:$0xff] %vm189_vm0, %v210_v32  ;;  %v241_v41 = vld [vmem:[#allocation6 + $0x8] sm:$0xff]  ;;  %s3228_s24 = sshll.u32 %s3473_s13, 4  ;;  %s3124_s13 = sshll.u32 %s3583_s15, 4  ;;  %s3125_s13 = int_to_ptr.vmem [resolvable:$true] %s3124_s13 }
  0x41   : > { %v265_v42 = vand.u32 4294901760, %v244_v39  ;;  %v267_v43 = vand.u32 4294901760, %v243_v40  ;;  %v3592_v44 = vand.u32 4294901760, %v241_v41  ;;  %235 = vst.msk [vmem:[#allocation2 + $0x23] sm:$0xff] %vm189_vm0, %v217_v36  ;;  %v240_v45 = vld [vmem:[#allocation6] sm:$0xff]  ;;  %v643_v16 = vld [vmem:[#allocation6 + $0x18] sm:$0xff]  ;;  %s3123_s17 = scalar_lea.hbm %s4211_s2, %s3228_s24 }
  0x42   : > { %v3595_v46 = vand.u32 4294901760, %v240_v45  ;;  %231 = vst.msk [vmem:[#allocation2 + $0x3] sm:$0xff] %vm189_vm0, %v218_v35  ;;  %v3624_v17 = vand.u32 4294901760, %v643_v16  ;;  %v642_v28 = vld [vmem:[#allocation6 + $0x10] sm:$0xff]  ;;  %s3126_s18 = sshll.u32 %s3123_s17, 4  ;;  %s3112_s19 = scalar_lea.sflag [#allocation5], %s3552_s30  ;;  %s3127_s18 = int_to_ptr.hbm [resolvable:$true] %s3126_s18 }
  0x43   : > { %v301_v47 = vsub.f32 %v244_v39, %v265_v42  ;;  %v307_v48 = vsub.f32 %v243_v40, %v267_v43  ;;  %367 = vmatpush.msra.mxu3 %v265_v42  ;;  %266 = vmatpush.msra.mxu0 %v265_v42  ;;  %v497_v49 = vsub.f32 %v241_v41, %v3592_v44  ;;  %v666_v29 = vand.u32 4294901760, %v642_v28  ;;  %s3373_s21 = sshra.s32 %s3127_s18, 4  ;;  %s3379_s3 = scalar_lea.hbm %s4211_s2, 32  ;;  %s3374_s21 = int_to_ptr.hbm [resolvable:$true] %s3373_s21 }
  0x44   : > { %232 = vst.msk [vmem:[#allocation2 + $0xb] sm:$0xff] %vm189_vm0, %v219_v37  ;;  %v3601_v50 = vsub.f32 %v240_v45, %v3595_v46  ;;  %v3631_v21 = vsub.f32 %v643_v16, %v3624_v17  ;;  %v844_v37 = vld [vmem:[#allocation6 + $0x88] sm:$0xff]  ;;  %v1048_v16 = vld [vmem:[#allocation6 + $0x20] sm:$0xff]  ;;  %s3375_s22 = scalar_lea.hbm %s3374_s21, 16  ;;  %p3380_p12 = scmp.lt.s32.totalorder %s3374_s21, %s4211_s2 }
  0x45   : > { %337 = vmatpush.msra.mxu2 %v301_v47  ;;  %v302_v51 = vand.u32 4294901760, %v301_v47  ;;  %369 = vmatpush.msra.mxu3 %v267_v43  ;;  %v308_v52 = vand.u32 4294901760, %v307_v48  ;;  %v498_v53 = vand.u32 4294901760, %v497_v49  ;;  %v706_v32 = vsub.f32 %v642_v28, %v666_v29  ;;  %p3376_p4 = scmp.ne.s32.totalorder %s3374_s21, %s3375_s22  ;;  %p3381_p11 = scmp.lt.s32.totalorder %s3379_s3, %s3375_s22 }
  0x46   : > { %268 = vmatpush.msra.mxu0 %v267_v43  ;;  %v504_v54 = vand.u32 4294901760, %v3601_v50  ;;  %v701_v23 = vand.u32 4294901760, %v3631_v21  ;;  %v865_v39 = vand.u32 4294901760, %v844_v37 }
  0x47   : > { %340 = vmatpush.msra.mxu2 %v307_v48  ;;  %v238_v55 = vld [vmem:[#allocation2 + $0x18] sm:$0xff]  ;;  %v303_v56 = vsub.f32 %v301_v47, %v302_v51  ;;  %v309_v57 = vsub.f32 %v307_v48, %v308_v52  ;;  %v499_v58 = vsub.f32 %v497_v49, %v498_v53  ;;  %v707_v34 = vand.u32 4294901760, %v706_v32  ;;  %p3377_p8 = pnand %p3376_p4, %p3522_p5  ;;  %p3382_p2 = por %p3381_p11, %p3380_p12 }
  0x48   : > { %400 = vmatpush.msrb.mxu0 %v302_v51  ;;  %v246_v59 = vsel %vm189_vm0, %v238_v55, 0  ;;  %v239_v60 = vld [vmem:[#allocation2 + $0x20] sm:$0xff]  ;;  %v505_v61 = vsub.f32 %v3601_v50, %v504_v54  ;;  %v702_v27 = vsub.f32 %v3631_v21, %v701_v23  ;;  %v3651_v41 = vsub.f32 %v844_v37, %v865_v39 }
  0x49   : > { %462 = vmatpush.msrb.mxu2 %v3592_v44  ;;  %v3607_v62 = vand.u32 4294901760, %v246_v59  ;;  %v304_v63 = vand.u32 4294901760, %v303_v56  ;;  %v310_v0 = vand.u32 4294901760, %v309_v57  ;;  %v500_v1 = vand.u32 4294901760, %v499_v58  ;;  %v236_v2 = vld [vmem:[#allocation2] sm:$0xff]  ;;  %p3378_p9 = pneg %p3377_p8 }
  0x4a   : > { %404 = vmatpush.msrb.mxu0 %v308_v52  ;;  %v249_v3 = vsel %vm189_vm0, %v239_v60, 0  ;;  %v506_v4 = vand.u32 4294901760, %v505_v61  ;;  %v442_v5 = vsel %vm189_vm0, %v236_v2, 0  ;;  %v703_v33 = vand.u32 4294901760, %v702_v27  ;;  %v637_v47 = vld [vmem:[#allocation2 + $0x1] sm:$0xff]  ;;  %v639_v56 = vld [vmem:[#allocation2 + $0x19] sm:$0xff] }
  0x4b   : > { %464 = vmatpush.msrb.mxu2 %v3595_v46  ;;  %v270_v6 = vsub.f32 %v246_v59, %v3607_v62  ;;  %305 = vmatpush.msra.mxu1 %v304_v63  ;;  %v3613_v7 = vand.u32 4294901760, %v249_v3  ;;  %v3615_v8 = vand.u32 4294901760, %v442_v5  ;;  %v237_v9 = vld [vmem:[#allocation2 + $0x8] sm:$0xff]  ;;  %v708_v36 = vsub.f32 %v706_v32, %v707_v34  ;;  %p3383_p13 = pnand %p3382_p2, %p3378_p9 }
  0x4c   : > { %501 = vmatpush.msrb.mxu3 %v500_v1  ;;  %v445_v13 = vsel %vm189_vm0, %v237_v9, 0  ;;  %v846_v58 = vsel %vm189_vm0, %v639_v56, 0 }
  0x4d   : > { %343 = vmatmul.f32.vlgmr.msra.gmra.mxu2 %v270_v6  ;;  %v271_v10 = vand.u32 4294901760, %v270_v6  ;;  %311 = vmatpush.msra.mxu1 %v310_v0  ;;  %v278_v11 = vsub.f32 %v249_v3, %v3613_v7  ;;  %v3619_v12 = vsub.f32 %v442_v5, %v3615_v8  ;;  %v3627_v20 = vand.u32 4294901760, %v445_v13  ;;  %v640_v0 = vld [vmem:[#allocation2 + $0x21] sm:$0xff]  ;;  %v1049_v5 = vld [vmem:[#allocation6 + $0x28] sm:$0xff] }
  0x4e   : > { %313 = vmatmul.f32.vlgmr.msra.gmra.mxu1 %v3607_v62  ;;  %507 = vmatpush.msrb.mxu3 %v506_v4  ;;  %v709_v38 = vand.u32 4294901760, %v708_v36  ;;  %v3676_v61 = vand.u32 4294901760, %v846_v58  ;;  %v849_v2 = vsel %vm189_vm0, %v640_v0, 0 }
  0x4f   : > { %373 = vmatmul.f32.vlgmr.msra.gmra.mxu3 %v271_v10  ;;  %v272_v14 = vsub.f32 %v270_v6, %v271_v10  ;;  %429 = vmatpush.msrb.mxu1 %v265_v42  ;;  %v279_v15 = vand.u32 4294901760, %v278_v11  ;;  %v467_v19 = vand.u32 4294901760, %v3619_v12  ;;  %v3638_v25 = vsub.f32 %v445_v13, %v3627_v20 }
  0x50   : > { %596 = vmatpush.msra.mxu2 %v498_v53  ;;  %625 = vmatpush.msra.mxu3 %v3592_v44  ;;  %v902_v42 = vand.u32 4294901760, %v3651_v41  ;;  %v3681_v1 = vsub.f32 %v846_v58, %v3676_v61  ;;  %v3685_v6 = vand.u32 4294901760, %v1049_v5 }
  0x51   : > { %v273_v18 = vand.u32 4294901760, %v272_v14  ;;  %431 = vmatpush.msrb.mxu1 %v267_v43  ;;  %v280_v22 = vsub.f32 %v278_v11, %v279_v15  ;;  %v468_v24 = vsub.f32 %v3619_v12, %v467_v19  ;;  %v475_v31 = vand.u32 4294901760, %v3638_v25  ;;  %v843_v43 = vld [vmem:[#allocation6 + $0x80] sm:$0xff] }
  0x52   : > { %600 = vmatpush.msra.mxu2 %v504_v54  ;;  %627 = vmatpush.msra.mxu3 %v3595_v46  ;;  %v903_v45 = vsub.f32 %v3651_v41, %v902_v42  ;;  %v638_v54 = vld [vmem:[#allocation2 + $0x9] sm:$0xff]  ;;  %v3691_v9 = vsub.f32 %v1049_v5, %v3685_v6 }
  0x53   : > { %563 = vmatpush.msra.mxu1 %v3592_v44  ;;  %274 = vmatmul.f32.vlgmr.msra.gmra.mxu0 %v273_v18  ;;  %v281_v26 = vand.u32 4294901760, %v280_v22  ;;  %v469_v30 = vand.u32 4294901760, %v468_v24  ;;  %v476_v35 = vsub.f32 %v3638_v25, %v475_v31  ;;  %v867_v44 = vand.u32 4294901760, %v843_v43 }
  0x54   : > { %533 = vmatpush.msra.mxu0 %v497_v49  ;;  %v645_v49 = vsel %vm189_vm0, %v637_v47, 0  ;;  %v648_v57 = vsel %vm189_vm0, %v638_v54, 0 }
  0x55   : > { %565 = vmatpush.msra.mxu1 %v3595_v46  ;;  %348 = vmatmul.f32.gmra.mxu2 %v278_v11  ;;  %v477_v40 = vand.u32 4294901760, %v476_v35  ;;  %v907_v46 = vsub.f32 %v843_v43, %v867_v44  ;;  %v3663_v53 = vand.u32 4294901760, %v645_v49  ;;  %v3674_v60 = vand.u32 4294901760, %v648_v57  ;;  %v1043_v35 = vld [vmem:[#allocation2 + $0x2] sm:$0xff] }
  0x56   : > { %317 = vmatmul.f32.gmra.mxu1 %v3613_v7  ;;  %536 = vmatpush.msra.mxu0 %v3601_v50  ;;  %v904_v50 = vand.u32 4294901760, %v903_v45  ;;  %v1107_v11 = vand.u32 4294901760, %v3691_v9  ;;  %v1051_v37 = vsel %vm189_vm0, %v1043_v35, 0 }
  0x57   : > { %379 = vmatmul.f32.gmra.mxu3 %v279_v15  ;;  %v908_v48 = vand.u32 4294901760, %v907_v46  ;;  %v669_v55 = vsub.f32 %v645_v49, %v3663_v53  ;;  %v677_v63 = vsub.f32 %v648_v57, %v3674_v60 }
  0x58   : > { %v1108_v15 = vsub.f32 %v3691_v9, %v1107_v11 }
  0x59   : > { %v909_v51 = vsub.f32 %v907_v46, %v908_v48  ;;  %v670_v59 = vand.u32 4294901760, %v669_v55  ;;  %v678_v4 = vand.u32 4294901760, %v677_v63 }
  0x5b   : > { %282 = vmatmul.f32.gmra.mxu0 %v281_v26  ;;  %v910_v52 = vand.u32 4294901760, %v909_v51  ;;  %v679_v10 = vsub.f32 %v677_v63, %v678_v4 }
  0x5d   : > { %470 = vmatmul.f32.vlgmr.msrb.gmra.mxu2 %v469_v30  ;;  %v680_v14 = vand.u32 4294901760, %v679_v10 }
  0x5e   : > { %433 = vmatmul.f32.vlgmr.msrb.gmra.mxu1 %v3607_v62  ;;  %736 = vmatpush.msrb.mxu2 %v3631_v21  ;;  %v1109_v21 = vand.u32 4294901760, %v1108_v15  ;;  %v1656_v15 = vld [vmem:[#allocation6 + $0xa8] sm:$0xff] }
  0x5f   : > { %509 = vmatmul.f32.vlgmr.msrb.gmra.mxu3 %v3615_v8  ;;  %704 = vmatpush.msrb.mxu1 %v703_v33 }
  0x60   : > { %766 = vmatpush.msrb.mxu3 %v3624_v17  ;;  %739 = vmatpush.msrb.mxu2 %v706_v32 }
  0x61   : > { %710 = vmatpush.msrb.mxu1 %v709_v38 }
  0x62   : > { %768 = vmatpush.msrb.mxu3 %v666_v29 }
  0x63   : > { %406 = vmatmul.f32.vlgmr.msrb.gmra.mxu0 %v3607_v62  ;;  %v671_v62 = vsub.f32 %v669_v55, %v670_v59 }
  0x64   : > { %665 = vmatpush.msrb.mxu0 %v3624_v17 }
  0x65   : > { %478 = vmatmul.f32.gmra.mxu2 %v477_v40  ;;  %v672_v3 = vand.u32 4294901760, %v671_v62 }
  0x66   : > { %437 = vmatmul.f32.gmra.mxu1 %v3613_v7  ;;  %667 = vmatpush.msrb.mxu0 %v666_v29 }
  0x67   : > { %513 = vmatmul.f32.gmra.mxu3 %v3627_v20 }
  0x6b   : > { %410 = vmatmul.f32.gmra.mxu0 %v3613_v7  ;;  %v871_v7 = vand.u32 4294901760, %v3681_v1 }
  0x6d   : > { %602 = vmatmul.f32.vlgmr.msra.gmra.mxu2 %v3615_v8 }
  0x6e   : > { %569 = vmatmul.f32.vlgmr.msra.gmra.mxu1 %v467_v19  ;;  %866 = vmatpush.msra.mxu2 %v865_v39 }
  0x6f   : > { %629 = vmatmul.f32.vlgmr.msra.gmra.mxu3 %v3615_v8  ;;  %828 = vmatpush.msra.mxu1 %v3624_v17  ;;  %v3688_v8 = vand.u32 4294901760, %v849_v2  ;;  %v1072_v17 = vand.u32 4294901760, %v1048_v16 }
  0x70   : > { %905 = vmatpush.msra.mxu3 %v904_v50  ;;  %868 = vmatpush.msra.mxu2 %v867_v44 }
  0x71   : > { %830 = vmatpush.msra.mxu1 %v666_v29  ;;  %v3697_v13 = vsub.f32 %v849_v2, %v3688_v8 }
  0x72   : > { %911 = vmatpush.msra.mxu3 %v910_v52  ;;  %v1046_v52 = vld [vmem:[#allocation2 + $0x22] sm:$0xff] }
  0x73   : > { %539 = vmatmul.f32.vlgmr.msra.gmra.mxu0 %v3619_v12  ;;  %v872_v12 = vsub.f32 %v3681_v1, %v871_v7  ;;  %v879_v19 = vand.u32 4294901760, %v3697_v13  ;;  %v1255_v54 = vsel %vm189_vm0, %v1046_v52, 0 }
  0x74   : > { %799 = vmatpush.msra.mxu0 %v701_v23  ;;  %v3744_v58 = vand.u32 4294901760, %v1255_v54 }
  0x75   : > { %606 = vmatmul.f32.gmra.mxu2 %v3627_v20  ;;  %v873_v18 = vand.u32 4294901760, %v872_v12  ;;  %v880_v23 = vsub.f32 %v3697_v13, %v879_v19 }
  0x76   : > { %575 = vmatmul.f32.gmra.mxu1 %v475_v31  ;;  %803 = vmatpush.msra.mxu0 %v707_v34  ;;  %v1249_v31 = vld [vmem:[#allocation6 + $0x90] sm:$0xff]  ;;  %v3751_v0 = vsub.f32 %v1255_v54, %v3744_v58 }
  0x77   : > { %633 = vmatmul.f32.gmra.mxu3 %v3627_v20  ;;  %v1112_v20 = vsub.f32 %v1048_v16, %v1072_v17  ;;  %v881_v28 = vand.u32 4294901760, %v880_v23  ;;  %v1273_v32 = vand.u32 4294901760, %v1249_v31  ;;  %v3771_v16 = vand.u32 4294901760, %v1656_v15  ;;  %v1452_v54 = vld [vmem:[#allocation2 + $0x23] sm:$0xff] }
  0x79   : > { %v1113_v22 = vand.u32 4294901760, %v1112_v20  ;;  %v1313_v34 = vsub.f32 %v1249_v31, %v1273_v32 }
  0x7b   : > { %544 = vmatmul.f32.gmra.mxu0 %v3638_v25  ;;  %v1114_v24 = vsub.f32 %v1112_v20, %v1113_v22  ;;  %v1250_v25 = vld [vmem:[#allocation6 + $0x98] sm:$0xff]  ;;  %v1314_v36 = vand.u32 4294901760, %v1313_v34 }
  0x7c   : > { %v1271_v27 = vand.u32 4294901760, %v1250_v25 }
  0x7d   : > { %742 = vmatmul.f32.vlgmr.msrb.gmra.mxu2 %v669_v55  ;;  %v1115_v26 = vand.u32 4294901760, %v1114_v24 }
  0x7e   : > { %712 = vmatmul.f32.vlgmr.msrb.gmra.mxu1 %v3663_v53  ;;  %1000 = vmatpush.msrb.mxu2 %v902_v42  ;;  %v3709_v29 = vsub.f32 %v1250_v25, %v1271_v27  ;;  %v1044_v42 = vld [vmem:[#allocation2 + $0xa] sm:$0xff] }
  0x7f   : > { %772 = vmatmul.f32.vlgmr.msrb.gmra.mxu3 %v670_v59  ;;  %967 = vmatpush.msrb.mxu1 %v865_v39  ;;  %v1054_v45 = vsel %vm189_vm0, %v1044_v42, 0  ;;  %v1455_v59 = vld [vmem:[#allocation6 + $0x38] sm:$0xff] }
  0x80   : > { %1029 = vmatpush.msrb.mxu3 %v865_v39  ;;  %1004 = vmatpush.msrb.mxu2 %v908_v48  ;;  %v1308_v30 = vand.u32 4294901760, %v3709_v29  ;;  %v1315_v39 = vsub.f32 %v1313_v34, %v1314_v36  ;;  %v3732_v48 = vand.u32 4294901760, %v1054_v45 }
  0x81   : > { %969 = vmatpush.msrb.mxu1 %v867_v44 }
  0x82   : > { %1031 = vmatpush.msrb.mxu3 %v867_v44  ;;  %v1309_v33 = vsub.f32 %v3709_v29, %v1308_v30  ;;  %v1316_v40 = vand.u32 4294901760, %v1315_v39  ;;  %v1045_v44 = vld [vmem:[#allocation2 + $0x1a] sm:$0xff]  ;;  %v1083_v51 = vsub.f32 %v1054_v45, %v3732_v48 }
  0x83   : > { %673 = vmatmul.f32.vlgmr.msrb.gmra.mxu0 %v672_v3  ;;  %v1454_v3 = vld [vmem:[#allocation6 + $0x30] sm:$0xff] }
  0x84   : > { %937 = vmatpush.msrb.mxu0 %v3651_v41  ;;  %v1310_v38 = vand.u32 4294901760, %v1309_v33  ;;  %v3721_v41 = vand.u32 4294901760, %v1051_v37  ;;  %v1084_v56 = vand.u32 4294901760, %v1083_v51  ;;  %v1478_v5 = vand.u32 4294901760, %v1454_v3  ;;  %v1451_v39 = vld [vmem:[#allocation2 + $0x1b] sm:$0xff] }
  0x85   : > { %747 = vmatmul.f32.gmra.mxu2 %v677_v63  ;;  %v1658_v42 = vsel %vm189_vm0, %v1451_v39, 0 }
  0x86   : > { %716 = vmatmul.f32.gmra.mxu1 %v3674_v60  ;;  %940 = vmatpush.msrb.mxu0 %v907_v46  ;;  %v1075_v43 = vsub.f32 %v1051_v37, %v3721_v41  ;;  %v1252_v46 = vsel %vm189_vm0, %v1045_v44, 0 }
  0x87   : > { %778 = vmatmul.f32.gmra.mxu3 %v678_v4  ;;  %v3734_v49 = vand.u32 4294901760, %v1252_v46 }
  0x88   : > { %v1076_v47 = vand.u32 4294901760, %v1075_v43 }
  0x8a   : > { %v1077_v50 = vsub.f32 %v1075_v43, %v1076_v47 }
  0x8b   : > { %681 = vmatmul.f32.gmra.mxu0 %v680_v14 }
  0x8c   : > { %v1078_v55 = vand.u32 4294901760, %v1077_v50 }
  0x8d   : > { %874 = vmatmul.f32.vlgmr.msra.gmra.mxu2 %v873_v18  ;;  %v3775_v18 = vsub.f32 %v1656_v15, %v3771_v16 }
  0x8e   : > { %832 = vmatmul.f32.vlgmr.msra.gmra.mxu1 %v3663_v53  ;;  %1142 = vmatpush.msra.mxu2 %v3691_v9 }
  0x8f   : > { %913 = vmatmul.f32.vlgmr.msra.gmra.mxu3 %v3676_v61  ;;  %1110 = vmatpush.msra.mxu1 %v1109_v21 }
  0x90   : > { %1172 = vmatpush.msra.mxu3 %v3685_v6  ;;  %1145 = vmatpush.msra.mxu2 %v1112_v20  ;;  %v1714_v20 = vand.u32 4294901760, %v3775_v18 }
  0x91   : > { %1116 = vmatpush.msra.mxu1 %v1115_v26 }
  0x92   : > { %1174 = vmatpush.msra.mxu3 %v1072_v17  ;;  %v1715_v23 = vsub.f32 %v3775_v18, %v1714_v20 }
  0x93   : > { %805 = vmatmul.f32.vlgmr.msra.gmra.mxu0 %v3663_v53  ;;  %v3739_v53 = vsub.f32 %v1252_v46, %v3734_v49 }
  0x94   : > { %1071 = vmatpush.msra.mxu0 %v3685_v6 }
  0x95   : > { %882 = vmatmul.f32.gmra.mxu2 %v881_v28  ;;  %v1277_v57 = vand.u32 4294901760, %v3739_v53 }
  0x96   : > { %836 = vmatmul.f32.gmra.mxu1 %v3674_v60  ;;  %1073 = vmatpush.msra.mxu0 %v1072_v17 }
  0x97   : > { %917 = vmatmul.f32.gmra.mxu3 %v3688_v8  ;;  %v1278_v63 = vsub.f32 %v3739_v53, %v1277_v57 }
  0x9b   : > { %809 = vmatmul.f32.gmra.mxu0 %v3674_v60  ;;  %v1476_v60 = vand.u32 4294901760, %v1455_v59 }
  0x9d   : > { %1006 = vmatmul.f32.vlgmr.msrb.gmra.mxu2 %v3676_v61  ;;  %v3747_v62 = vsub.f32 %v1455_v59, %v1476_v60 }
  0x9e   : > { %973 = vmatmul.f32.vlgmr.msrb.gmra.mxu1 %v871_v7  ;;  %1272 = vmatpush.msrb.mxu2 %v1271_v27  ;;  %v1285_v7 = vand.u32 4294901760, %v3751_v0 }
  0x9f   : > { %1033 = vmatmul.f32.vlgmr.msrb.gmra.mxu3 %v3676_v61  ;;  %1234 = vmatpush.msrb.mxu1 %v3685_v6  ;;  %v1085_v61 = vsub.f32 %v1083_v51, %v1084_v56  ;;  %v1279_v6 = vand.u32 4294901760, %v1278_v63 }
  0xa0   : > { %1311 = vmatpush.msrb.mxu3 %v1310_v38  ;;  %1274 = vmatpush.msrb.mxu2 %v1273_v32 }
  0xa1   : > { %1236 = vmatpush.msrb.mxu1 %v1072_v17  ;;  %v1086_v2 = vand.u32 4294901760, %v1085_v61  ;;  %v1655_v17 = vld [vmem:[#allocation6 + $0xa0] sm:$0xff] }
  0xa2   : > { %1317 = vmatpush.msrb.mxu3 %v1316_v40 }
  0xa3   : > { %943 = vmatmul.f32.vlgmr.msrb.gmra.mxu0 %v3681_v1  ;;  %v1513_v1 = vand.u32 4294901760, %v3747_v62 }
  0xa4   : > { %1205 = vmatpush.msrb.mxu0 %v1107_v11  ;;  %v1286_v11 = vsub.f32 %v3751_v0, %v1285_v7 }
  0xa5   : > { %1010 = vmatmul.f32.gmra.mxu2 %v3688_v8  ;;  %v1514_v4 = vsub.f32 %v3747_v62, %v1513_v1 }
  0xa6   : > { %979 = vmatmul.f32.gmra.mxu1 %v879_v19  ;;  %1209 = vmatpush.msrb.mxu0 %v1113_v22  ;;  %v1287_v14 = vand.u32 4294901760, %v1286_v11  ;;  %v3777_v19 = vand.u32 4294901760, %v1655_v17  ;;  %v1449_v22 = vld [vmem:[#allocation2 + $0x3] sm:$0xff] }
  0xa7   : > { %1037 = vmatmul.f32.gmra.mxu3 %v3688_v8  ;;  %v3759_v8 = vsub.f32 %v1454_v3, %v1478_v5  ;;  %v1515_v9 = vand.u32 4294901760, %v1514_v4  ;;  %v1457_v26 = vsel %vm189_vm0, %v1449_v22, 0 }
  0xa8   : > { %v3782_v21 = vsub.f32 %v1655_v17, %v3777_v19 }
  0xa9   : > { %v1519_v10 = vand.u32 4294901760, %v3759_v8 }
  0xaa   : > { %v1720_v24 = vand.u32 4294901760, %v3782_v21 }
  0xab   : > { %948 = vmatmul.f32.gmra.mxu0 %v3697_v13  ;;  %v1520_v12 = vsub.f32 %v3759_v8, %v1519_v10 }
  0xac   : > { %v1721_v28 = vsub.f32 %v3782_v21, %v1720_v24 }
  0xad   : > { %1148 = vmatmul.f32.vlgmr.msra.gmra.mxu2 %v1075_v43  ;;  %v1521_v13 = vand.u32 4294901760, %v1520_v12 }
  0xae   : > { %1118 = vmatmul.f32.vlgmr.msra.gmra.mxu1 %v3721_v41  ;;  %1406 = vmatpush.msra.mxu2 %v1308_v30  ;;  %v3792_v30 = vand.u32 4294901760, %v1457_v26 }
  0xaf   : > { %1178 = vmatmul.f32.vlgmr.msra.gmra.mxu3 %v1076_v47  ;;  %1373 = vmatpush.msra.mxu1 %v1271_v27 }
  0xb0   : > { %1435 = vmatpush.msra.mxu3 %v1271_v27  ;;  %1410 = vmatpush.msra.mxu2 %v1314_v36  ;;  %v1716_v27 = vand.u32 4294901760, %v1715_v23  ;;  %v1481_v38 = vsub.f32 %v1457_v26, %v3792_v30 }
  0xb1   : > { %1375 = vmatpush.msra.mxu1 %v1273_v32 }
  0xb2   : > { %1437 = vmatpush.msra.mxu3 %v1273_v32  ;;  %v1482_v43 = vand.u32 4294901760, %v1481_v38 }
  0xb3   : > { %1079 = vmatmul.f32.vlgmr.msra.gmra.mxu0 %v1078_v55 }
  0xb4   : > { %1343 = vmatpush.msra.mxu0 %v3709_v29  ;;  %v1722_v29 = vand.u32 4294901760, %v1721_v28  ;;  %v1483_v52 = vsub.f32 %v1481_v38, %v1482_v43 }
  0xb5   : > { %1153 = vmatmul.f32.gmra.mxu2 %v1083_v51 }
  0xb6   : > { %1122 = vmatmul.f32.gmra.mxu1 %v3732_v48  ;;  %1346 = vmatpush.msra.mxu0 %v1313_v34  ;;  %v1450_v34 = vld [vmem:[#allocation2 + $0xb] sm:$0xff] }
  0xb7   : > { %1184 = vmatmul.f32.gmra.mxu3 %v1084_v56  ;;  %v1460_v40 = vsel %vm189_vm0, %v1450_v34, 0 }
  0xb8   : > { %v3805_v44 = vand.u32 4294901760, %v1460_v40 }
  0xbb   : > { %1087 = vmatmul.f32.gmra.mxu0 %v1086_v2 }
  0xbd   : > { %1280 = vmatmul.f32.vlgmr.msrb.gmra.mxu2 %v1279_v6 }
  0xbe   : > { %1238 = vmatmul.f32.vlgmr.msrb.gmra.mxu1 %v3721_v41  ;;  %1548 = vmatpush.msrb.mxu2 %v3747_v62 }
  0xbf   : > { %1319 = vmatmul.f32.vlgmr.msrb.gmra.mxu3 %v3734_v49  ;;  %1516 = vmatpush.msrb.mxu1 %v1515_v9 }
  0xc0   : > { %1578 = vmatpush.msrb.mxu3 %v1476_v60  ;;  %1551 = vmatpush.msrb.mxu2 %v3759_v8 }
  0xc1   : > { %1522 = vmatpush.msrb.mxu1 %v1521_v13 }
  0xc2   : > { %1580 = vmatpush.msrb.mxu3 %v1478_v5 }
  0xc3   : > { %1211 = vmatmul.f32.vlgmr.msrb.gmra.mxu0 %v3721_v41 }
  0xc4   : > { %1477 = vmatpush.msrb.mxu0 %v1476_v60 }
  0xc5   : > { %1288 = vmatmul.f32.gmra.mxu2 %v1287_v14  ;;  %v1860_v14 = vld [vmem:[#allocation6 + $0x40] sm:$0xff] }
  0xc6   : > { %1242 = vmatmul.f32.gmra.mxu1 %v3732_v48  ;;  %1479 = vmatpush.msrb.mxu0 %v1478_v5 }
  0xc7   : > { %1323 = vmatmul.f32.gmra.mxu3 %v3744_v58 }
  0xcb   : > { %1215 = vmatmul.f32.gmra.mxu0 %v3732_v48  ;;  %v314_v25 = vpop.f32.mrf.mxu1  ;;  %v3807_v48 = vand.u32 4294901760, %v1658_v42 }
  0xcd   : > { %1412 = vmatmul.f32.vlgmr.msra.gmra.mxu2 %v3734_v49  ;;  %v3812_v56 = vsub.f32 %v1658_v42, %v3807_v48 }
  0xce   : > { %1379 = vmatmul.f32.vlgmr.msra.gmra.mxu1 %v1277_v57  ;;  %1678 = vmatpush.msra.mxu2 %v3771_v16  ;;  %v1661_v57 = vsel %vm189_vm0, %v1452_v54, 0  ;;  %v1855_v54 = vld [vmem:[#allocation2 + $0x4] sm:$0xff] }
  0xcf   : > { %1439 = vmatmul.f32.vlgmr.msra.gmra.mxu3 %v3734_v49  ;;  %1640 = vmatpush.msra.mxu1 %v1476_v60  ;;  %v1683_v63 = vand.u32 4294901760, %v3812_v56 }
  0xd0   : > { %v275_v31 = vpop.f32.mrf.mxu0  ;;  %v344_v32 = vpop.f32.mrf.mxu2  ;;  %1717 = vmatpush.msra.mxu3 %v1716_v27  ;;  %1680 = vmatpush.msra.mxu2 %v3777_v19 }
  0xd1   : > { %v315_v33 = vadd.f32 %v314_v25, %v275_v31  ;;  %1642 = vmatpush.msra.mxu1 %v1478_v5  ;;  %v1684_v9 = vsub.f32 %v3812_v56, %v1683_v63 }
  0xd2   : > { %v374_v35 = vpop.f32.mrf.mxu3  ;;  %1723 = vmatpush.msra.mxu3 %v1722_v29 }
  0xd3   : > { %v345_v36 = vadd.f32 %v344_v32, %v315_v33  ;;  %1349 = vmatmul.f32.vlgmr.msra.gmra.mxu0 %v3739_v53  ;;  %v318_v37 = vpop.f32.mrf.mxu1  ;;  %v1489_v53 = vsub.f32 %v1460_v40, %v3805_v44 }
  0xd4   : > { %1611 = vmatpush.msra.mxu0 %v1513_v1  ;;  %v1861_v1 = vld [vmem:[#allocation6 + $0x48] sm:$0xff] }
  0xd5   : > { %v375_v41 = vadd.f32 %v374_v35, %v345_v36  ;;  %1416 = vmatmul.f32.gmra.mxu2 %v3744_v58  ;;  %v1490_v59 = vand.u32 4294901760, %v1489_v53  ;;  %v3823_v3 = vand.u32 4294901760, %v1861_v1 }
  0xd6   : > { %1385 = vmatmul.f32.gmra.mxu1 %v1285_v7  ;;  %1615 = vmatpush.msra.mxu0 %v1519_v10 }
  0xd7   : > { %1443 = vmatmul.f32.gmra.mxu3 %v3744_v58  ;;  %v1484_v58 = vand.u32 4294901760, %v1483_v52  ;;  %v1491_v6 = vsub.f32 %v1489_v53, %v1490_v59  ;;  %v3827_v7 = vsub.f32 %v1861_v1, %v3823_v3 }
  0xd8   : > { %v283_v45 = vpop.f32.mrf.mxu0  ;;  %v349_v46 = vpop.f32.mrf.mxu2 }
  0xd9   : > { %v319_v47 = vadd.f32 %v318_v37, %v283_v45  ;;  %v1919_v11 = vand.u32 4294901760, %v3827_v7  ;;  %v1492_v13 = vand.u32 4294901760, %v1491_v6  ;;  %v2061_v45 = vld [vmem:[#allocation6 + $0xb0] sm:$0xff] }
  0xda   : > { %v380_v49 = vpop.f32.mrf.mxu3 }
  0xdb   : > { %v350_v50 = vadd.f32 %v349_v46, %v319_v47  ;;  %1354 = vmatmul.f32.gmra.mxu0 %v3751_v0  ;;  %v434_v51 = vpop.f32.mrf.mxu1  ;;  %v3819_v0 = vand.u32 4294901760, %v1661_v57  ;;  %v1920_v17 = vsub.f32 %v3827_v7, %v1919_v11  ;;  %v3869_v47 = vand.u32 4294901760, %v2061_v45 }
  0xdd   : > { %v381_v55 = vadd.f32 %v380_v49, %v350_v50  ;;  %1554 = vmatmul.f32.vlgmr.msrb.gmra.mxu2 %v1481_v38  ;;  %v3833_v10 = vsub.f32 %v1661_v57, %v3819_v0  ;;  %v1921_v26 = vand.u32 4294901760, %v1920_v17  ;;  %v3876_v52 = vsub.f32 %v2061_v45, %v3869_v47 }
  0xde   : > { %1524 = vmatmul.f32.vlgmr.msrb.gmra.mxu1 %v3792_v30  ;;  %1812 = vmatpush.msrb.mxu2 %v1714_v20  ;;  %v1685_v20 = vand.u32 4294901760, %v1684_v9 }
  0xdf   : > { %1584 = vmatmul.f32.vlgmr.msrb.gmra.mxu3 %v1482_v43  ;;  %1779 = vmatpush.msrb.mxu1 %v3771_v16  ;;  %v1691_v22 = vand.u32 4294901760, %v3833_v10 }
  0xe0   : > { %v407_v60 = vpop.f32.mrf.mxu0  ;;  %v471_v61 = vpop.f32.mrf.mxu2  ;;  %1841 = vmatpush.msrb.mxu3 %v3771_v16  ;;  %1816 = vmatpush.msrb.mxu2 %v1720_v24 }
  0xe1   : > { %v408_v62 = vadd.f32 %v407_v60, %v375_v41  ;;  %1781 = vmatpush.msrb.mxu1 %v3777_v19  ;;  %v1692_v29 = vsub.f32 %v3833_v10, %v1691_v22  ;;  %v2062_v41 = vld [vmem:[#allocation6 + $0xb8] sm:$0xff] }
  0xe2   : > { %v510_v2 = vpop.f32.mrf.mxu3  ;;  %1843 = vmatpush.msrb.mxu3 %v3777_v19  ;;  %v3862_v42 = vand.u32 4294901760, %v2062_v41 }
  0xe3   : > { %v435_v4 = vadd.f32 %v434_v51, %v408_v62  ;;  %1485 = vmatmul.f32.vlgmr.msrb.gmra.mxu0 %v1484_v58  ;;  %v438_v5 = vpop.f32.mrf.mxu1  ;;  %v1693_v37 = vand.u32 4294901760, %v1692_v29  ;;  %v2126_v58 = vand.u32 4294901760, %v3876_v52 }
  0xe4   : > { %1749 = vmatpush.msrb.mxu0 %v3775_v18  ;;  %v3841_v18 = vand.u32 4294901760, %v1860_v14  ;;  %v3867_v46 = vsub.f32 %v2062_v41, %v3862_v42 }
  0xe5   : > { %v472_v8 = vadd.f32 %v471_v61, %v435_v4  ;;  %1559 = vmatmul.f32.gmra.mxu2 %v1489_v53  ;;  %v1863_v61 = vsel %vm189_vm0, %v1855_v54, 0  ;;  %v2127_v1 = vsub.f32 %v3876_v52, %v2126_v58 }
  0xe6   : > { %1528 = vmatmul.f32.gmra.mxu1 %v3805_v44  ;;  %1752 = vmatpush.msrb.mxu0 %v3782_v21  ;;  %v3845_v21 = vsub.f32 %v1860_v14, %v3841_v18  ;;  %v2120_v51 = vand.u32 4294901760, %v3867_v46 }
  0xe7   : > { %v511_v12 = vadd.f32 %v510_v2, %v472_v8  ;;  %1590 = vmatmul.f32.gmra.mxu3 %v1490_v59  ;;  %v2128_v4 = vand.u32 4294901760, %v2127_v1 }
  0xe8   : > { %v411_v15 = vpop.f32.mrf.mxu0  ;;  %v479_v16 = vpop.f32.mrf.mxu2  ;;  %v1925_v27 = vand.u32 4294901760, %v3845_v21  ;;  %v2121_v57 = vsub.f32 %v3867_v46, %v2120_v51 }
  0xe9   : > { %v412_v19 = vadd.f32 %v411_v15, %v381_v55  ;;  %v1857_v15 = vld [vmem:[#allocation2 + $0x1c] sm:$0xff] }
  0xea   : > { %v514_v23 = vpop.f32.mrf.mxu3  ;;  %v1926_v31 = vsub.f32 %v3845_v21, %v1925_v27  ;;  %v2122_v62 = vand.u32 4294901760, %v2121_v57 }
  0xeb   : > { %v439_v24 = vadd.f32 %v438_v5, %v412_v19  ;;  %1493 = vmatmul.f32.gmra.mxu0 %v1492_v13  ;;  %v570_v25 = vpop.f32.mrf.mxu1 }
  0xec   : > { %v1927_v35 = vand.u32 4294901760, %v1926_v31 }
  0xed   : > { %v480_v28 = vadd.f32 %v479_v16, %v439_v24  ;;  %1686 = vmatmul.f32.vlgmr.msra.gmra.mxu2 %v1685_v20 }
  0xee   : > { %1644 = vmatmul.f32.vlgmr.msra.gmra.mxu1 %v3792_v30  ;;  %1954 = vmatpush.msra.mxu2 %v3827_v7 }
  0xef   : > { %v515_v32 = vadd.f32 %v514_v23, %v480_v28  ;;  %1725 = vmatmul.f32.vlgmr.msra.gmra.mxu3 %v3807_v48  ;;  %1922 = vmatpush.msra.mxu1 %v1921_v26  ;;  %v1858_v26 = vld [vmem:[#allocation2 + $0x24] sm:$0xff] }
  0xf0   : > { %v540_v33 = vpop.f32.mrf.mxu0  ;;  %v603_v34 = vpop.f32.mrf.mxu2  ;;  %1984 = vmatpush.msra.mxu3 %v3823_v3  ;;  %1957 = vmatpush.msra.mxu2 %v3845_v21  ;;  %v2067_v28 = vsel %vm189_vm0, %v1858_v26, 0 }
  0xf1   : > { %v541_v36 = vadd.f32 %v540_v33, %v511_v12  ;;  %1928 = vmatpush.msra.mxu1 %v1927_v35  ;;  %v1856_v12 = vld [vmem:[#allocation2 + $0xc] sm:$0xff]  ;;  %v3925_v35 = vand.u32 4294901760, %v2067_v28 }
  0xf2   : > { %v630_v38 = vpop.f32.mrf.mxu3  ;;  %1986 = vmatpush.msra.mxu3 %v3841_v18 }
  0xf3   : > { %v571_v39 = vadd.f32 %v570_v25, %v541_v36  ;;  %1617 = vmatmul.f32.vlgmr.msra.gmra.mxu0 %v3792_v30  ;;  %v576_v40 = vpop.f32.mrf.mxu1  ;;  %v2267_v36 = vld [vmem:[#allocation6 + $0x58] sm:$0xff] }
  0xf4   : > { %1883 = vmatpush.msra.mxu0 %v3823_v3 }
  0xf5   : > { %v604_v43 = vadd.f32 %v603_v34, %v571_v39  ;;  %1694 = vmatmul.f32.gmra.mxu2 %v1693_v37 }
  0xf6   : > { %1648 = vmatmul.f32.gmra.mxu1 %v3805_v44  ;;  %1885 = vmatpush.msra.mxu0 %v3841_v18 }
  0xf7   : > { %v3871_v49 = vadd.f32 %v630_v38, %v604_v43  ;;  %1729 = vmatmul.f32.gmra.mxu3 %v3819_v0  ;;  %v3929_v38 = vand.u32 4294901760, %v2267_v36 }
  0xf8   : > { %v545_v30 = vpop.f32.mrf.mxu0  ;;  %v607_v50 = vpop.f32.mrf.mxu2 }
  0xf9   : > { %v546_v53 = vadd.f32 %v545_v30, %v515_v32  ;;  %v3933_v43 = vsub.f32 %v2267_v36, %v3929_v38 }
  0xfa   : > { %v634_v55 = vpop.f32.mrf.mxu3 }
  0xfb   : > { %v577_v59 = vadd.f32 %v576_v40, %v546_v53  ;;  %1621 = vmatmul.f32.gmra.mxu0 %v3805_v44  ;;  %v713_v60 = vpop.f32.mrf.mxu1  ;;  %v3892_v44 = vand.u32 4294901760, %v1863_v61 }
  0xfd   : > { %v608_v2 = vadd.f32 %v607_v50, %v577_v59  ;;  %1818 = vmatmul.f32.vlgmr.msrb.gmra.mxu2 %v3807_v48  ;;  %v2325_v50 = vand.u32 4294901760, %v3933_v43 }
  0xfe   : > { %1785 = vmatmul.f32.vlgmr.msrb.gmra.mxu1 %v1683_v63  ;;  %2084 = vmatpush.msrb.mxu2 %v3862_v42 }
  0xff   : > { %v3889_v5 = vadd.f32 %v634_v55, %v608_v2  ;;  %1845 = vmatmul.f32.vlgmr.msrb.gmra.mxu3 %v3807_v48  ;;  %2046 = vmatpush.msrb.mxu1 %v3823_v3  ;;  %v1887_v48 = vsub.f32 %v1863_v61, %v3892_v44  ;;  %v1866_v3 = vsel %vm189_vm0, %v1856_v12, 0 }
 0x100   : > { %v674_v6 = vpop.f32.mrf.mxu0  ;;  %v743_v8 = vpop.f32.mrf.mxu2  ;;  %2123 = vmatpush.msrb.mxu3 %v2122_v62  ;;  %2086 = vmatpush.msrb.mxu2 %v3869_v47 }
 0x101   : > { %v714_v9 = vadd.f32 %v713_v60, %v674_v6  ;;  %2048 = vmatpush.msrb.mxu1 %v3841_v18  ;;  %v1888_v17 = vand.u32 4294901760, %v1887_v48  ;;  %v3909_v18 = vand.u32 4294901760, %v1866_v3 }
 0x102   : > { %v773_v63 = vpop.f32.mrf.mxu3  ;;  %2129 = vmatpush.msrb.mxu3 %v2128_v4 }
 0x103   : > { %v744_v13 = vadd.f32 %v743_v8, %v714_v9  ;;  %1755 = vmatmul.f32.vlgmr.msrb.gmra.mxu0 %v3812_v56  ;;  %v717_v14 = vpop.f32.mrf.mxu1  ;;  %v2064_v56 = vsel %vm189_vm0, %v1857_v15, 0  ;;  %v1889_v25 = vsub.f32 %v1887_v48, %v1888_v17  ;;  %v1895_v21 = vsub.f32 %v1866_v3, %v3909_v18 }
 0x104   : > { %2017 = vmatpush.msrb.mxu0 %v1919_v11  ;;  %v3911_v20 = vand.u32 4294901760, %v2064_v56 }
 0x105   : > { %v774_v16 = vadd.f32 %v773_v63, %v744_v13  ;;  %1822 = vmatmul.f32.gmra.mxu2 %v3819_v0  ;;  %v1890_v29 = vand.u32 4294901760, %v1889_v25  ;;  %v1896_v31 = vand.u32 4294901760, %v1895_v21 }
 0x106   : > { %1791 = vmatmul.f32.gmra.mxu1 %v1691_v22  ;;  %2021 = vmatpush.msrb.mxu0 %v1925_v27 }
 0x107   : > { %1849 = vmatmul.f32.gmra.mxu3 %v3819_v0  ;;  %v3916_v0 = vsub.f32 %v2064_v56, %v3911_v20 }
 0x108   : > { %v682_v7 = vpop.f32.mrf.mxu0  ;;  %v748_v11 = vpop.f32.mrf.mxu2 }
 0x109   : > { %v718_v19 = vadd.f32 %v717_v14, %v682_v7  ;;  %v2089_v34 = vand.u32 4294901760, %v3916_v0  ;;  %v2467_v7 = vld [vmem:[#allocation6 + $0xc0] sm:$0xff] }
 0x10a   : > { %v779_v23 = vpop.f32.mrf.mxu3 }
 0x10b   : > { %v749_v24 = vadd.f32 %v748_v11, %v718_v19  ;;  %1760 = vmatmul.f32.gmra.mxu0 %v3833_v10  ;;  %v833_v22 = vpop.f32.mrf.mxu1  ;;  %v2090_v30 = vsub.f32 %v3916_v0, %v2089_v34  ;;  %v3977_v19 = vand.u32 4294901760, %v2467_v7 }
 0x10d   : > { %v780_v27 = vadd.f32 %v779_v23, %v749_v24  ;;  %1960 = vmatmul.f32.vlgmr.msra.gmra.mxu2 %v1887_v48  ;;  %v3982_v25 = vsub.f32 %v2467_v7, %v3977_v19 }
 0x10e   : > { %1930 = vmatmul.f32.vlgmr.msra.gmra.mxu1 %v3892_v44  ;;  %2218 = vmatpush.msra.mxu2 %v2120_v51  ;;  %v2266_v51 = vld [vmem:[#allocation6 + $0x50] sm:$0xff] }
 0x10f   : > { %1990 = vmatmul.f32.vlgmr.msra.gmra.mxu3 %v1888_v17  ;;  %2185 = vmatpush.msra.mxu1 %v3862_v42  ;;  %v3948_v55 = vand.u32 4294901760, %v2266_v51 }
 0x110   : > { %v806_v10 = vpop.f32.mrf.mxu0  ;;  %v875_v32 = vpop.f32.mrf.mxu2  ;;  %2247 = vmatpush.msra.mxu3 %v3862_v42  ;;  %2222 = vmatpush.msra.mxu2 %v2126_v58  ;;  %v1897_v42 = vsub.f32 %v1895_v21, %v1896_v31  ;;  %v2091_v58 = vand.u32 4294901760, %v2090_v30 }
 0x111   : > { %v807_v33 = vadd.f32 %v806_v10, %v774_v16  ;;  %2187 = vmatpush.msra.mxu1 %v3869_v47  ;;  %v2468_v16 = vld [vmem:[#allocation6 + $0xc8] sm:$0xff] }
 0x112   : > { %v914_v37 = vpop.f32.mrf.mxu3  ;;  %2249 = vmatpush.msra.mxu3 %v3869_v47  ;;  %v3940_v47 = vsub.f32 %v2067_v28, %v3925_v35  ;;  %v3970_v56 = vand.u32 4294901760, %v2468_v16 }
 0x113   : > { %v834_v39 = vadd.f32 %v833_v22, %v807_v33  ;;  %1891 = vmatmul.f32.vlgmr.msra.gmra.mxu0 %v1890_v29  ;;  %v915_v40 = vadd.f32 %v914_v37, %v875_v32  ;;  %v837_v41 = vpop.f32.mrf.mxu1 }
 0x114   : > { %2155 = vmatpush.msra.mxu0 %v3867_v46  ;;  %v1898_v46 = vand.u32 4294901760, %v1897_v42  ;;  %v2097_v59 = vand.u32 4294901760, %v3940_v47  ;;  %v3975_v11 = vsub.f32 %v2468_v16, %v3970_v56 }
 0x115   : > { %v840_v45 = vadd.f32 %v834_v39, %v3871_v49  ;;  %1965 = vmatmul.f32.gmra.mxu2 %v1895_v21  ;;  %v2326_v49 = vsub.f32 %v3933_v43, %v2325_v50 }
 0x116   : > { %1934 = vmatmul.f32.gmra.mxu1 %v3909_v18  ;;  %2158 = vmatpush.msra.mxu0 %v3876_v52  ;;  %v3952_v52 = vsub.f32 %v2266_v51, %v3948_v55  ;;  %v2098_v8 = vsub.f32 %v3940_v47, %v2097_v59  ;;  %v2526_v22 = vand.u32 4294901760, %v3975_v11  ;;  %v2262_v51 = vld [vmem:[#allocation2 + $0xd] sm:$0xff] }
 0x117   : > { %1996 = vmatmul.f32.gmra.mxu3 %v1896_v31  ;;  %v2327_v2 = vand.u32 4294901760, %v2326_v49  ;;  %v2532_v31 = vand.u32 4294901760, %v3982_v25  ;;  %v2272_v49 = vsel %vm189_vm0, %v2262_v51, 0 }
 0x118   : > { %v810_v53 = vpop.f32.mrf.mxu0  ;;  %v883_v54 = vpop.f32.mrf.mxu2  ;;  %v2331_v4 = vand.u32 4294901760, %v3952_v52  ;;  %v2099_v14 = vand.u32 4294901760, %v2098_v8  ;;  %v2527_v29 = vsub.f32 %v3975_v11, %v2526_v22 }
 0x119   : > { %v811_v57 = vadd.f32 %v810_v53, %v780_v27  ;;  %v2261_v27 = vld [vmem:[#allocation2 + $0x5] sm:$0xff]  ;;  %v2533_v37 = vsub.f32 %v3982_v25, %v2532_v31 }
 0x11a   : > { %v918_v60 = vpop.f32.mrf.mxu3  ;;  %v2332_v9 = vsub.f32 %v3952_v52, %v2331_v4  ;;  %v2269_v33 = vsel %vm189_vm0, %v2261_v27, 0  ;;  %v2528_v36 = vand.u32 4294901760, %v2527_v29 }
 0x11b   : > { %v838_v61 = vadd.f32 %v837_v41, %v811_v57  ;;  %1899 = vmatmul.f32.gmra.mxu0 %v1898_v46  ;;  %v919_v62 = vadd.f32 %v918_v60, %v883_v54  ;;  %v974_v1 = vpop.f32.mrf.mxu1 }
 0x11d   : > { %v841_v6 = vadd.f32 %v838_v61, %v3889_v5  ;;  %2092 = vmatmul.f32.vlgmr.msrb.gmra.mxu2 %v2091_v58  ;;  %v2333_v5 = vand.u32 4294901760, %v2332_v9  ;;  %v4017_v58 = vand.u32 4294901760, %v2272_v49 }
 0x11e   : > { %2050 = vmatmul.f32.vlgmr.msrb.gmra.mxu1 %v3892_v44  ;;  %2360 = vmatpush.msrb.mxu2 %v3933_v43 }
 0x11f   : > { %2131 = vmatmul.f32.vlgmr.msrb.gmra.mxu3 %v3911_v20  ;;  %2328 = vmatpush.msrb.mxu1 %v2327_v2 }
 0x120   : > { %v944_v12 = vpop.f32.mrf.mxu0  ;;  %v1007_v63 = vpop.f32.mrf.mxu2  ;;  %2390 = vmatpush.msrb.mxu3 %v3929_v38  ;;  %2363 = vmatpush.msrb.mxu2 %v3952_v52  ;;  %v2301_v52 = vsub.f32 %v2272_v49, %v4017_v58 }
 0x121   : > { %v945_v13 = vadd.f32 %v944_v12, %v915_v40  ;;  %2334 = vmatpush.msrb.mxu1 %v2333_v5  ;;  %v2534_v40 = vand.u32 4294901760, %v2533_v37 }
 0x122   : > { %v1034_v48 = vpop.f32.mrf.mxu3  ;;  %2392 = vmatpush.msrb.mxu3 %v3948_v55  ;;  %v2302_v12 = vand.u32 4294901760, %v2301_v52 }
 0x123   : > { %v975_v15 = vadd.f32 %v974_v1, %v945_v13  ;;  %2023 = vmatmul.f32.vlgmr.msrb.gmra.mxu0 %v3892_v44  ;;  %v980_v3 = vpop.f32.mrf.mxu1 }
 0x124   : > { %2289 = vmatpush.msrb.mxu0 %v3929_v38  ;;  %v2303_v7 = vsub.f32 %v2301_v52, %v2302_v12 }
 0x125   : > { %v1008_v17 = vadd.f32 %v1007_v63, %v975_v15  ;;  %2100 = vmatmul.f32.gmra.mxu2 %v2099_v14 }
 0x126   : > { %2054 = vmatmul.f32.gmra.mxu1 %v3909_v18  ;;  %2291 = vmatpush.msrb.mxu0 %v3948_v55 }
 0x127   : > { %v1035_v23 = vadd.f32 %v1034_v48, %v1008_v17  ;;  %2135 = vmatmul.f32.gmra.mxu3 %v3925_v35  ;;  %v2673_v48 = vld [vmem:[#allocation6 + $0x68] sm:$0xff] }
 0x128   : > { %v949_v44 = vpop.f32.mrf.mxu0  ;;  %v1011_v24 = vpop.f32.mrf.mxu2 }
 0x129   : > { %v3984_v21 = vadd.f32 %v1035_v23, %v840_v45  ;;  %v950_v26 = vadd.f32 %v949_v44, %v919_v62 }
 0x12a   : > { %v1038_v28 = vpop.f32.mrf.mxu3 }
 0x12b   : > { %v981_v10 = vadd.f32 %v980_v3, %v950_v26  ;;  %2027 = vmatmul.f32.gmra.mxu0 %v3909_v18  ;;  %v1119_v32 = vpop.f32.mrf.mxu1  ;;  %v3998_v18 = vand.u32 4294901760, %v2269_v33  ;;  %v4037_v3 = vand.u32 4294901760, %v2673_v48  ;;  %v2672_v26 = vld [vmem:[#allocation6 + $0x60] sm:$0xff] }
 0x12c   : > { %v4056_v29 = vand.u32 4294901760, %v2672_v26 }
 0x12d   : > { %v1012_v39 = vadd.f32 %v1011_v24, %v981_v10  ;;  %2224 = vmatmul.f32.vlgmr.msra.gmra.mxu2 %v3911_v20  ;;  %v2293_v54 = vsub.f32 %v2269_v33, %v3998_v18  ;;  %v4041_v23 = vsub.f32 %v2673_v48, %v4037_v3 }
 0x12e   : > { %2191 = vmatmul.f32.vlgmr.msra.gmra.mxu1 %v2089_v34  ;;  %2490 = vmatpush.msra.mxu2 %v3970_v56 }
 0x12f   : > { %v1039_v41 = vadd.f32 %v1038_v28, %v1012_v39  ;;  %2251 = vmatmul.f32.vlgmr.msra.gmra.mxu3 %v3911_v20  ;;  %2452 = vmatpush.msra.mxu1 %v3929_v38  ;;  %v2263_v38 = vld [vmem:[#allocation2 + $0x1d] sm:$0xff] }
 0x130   : > { %v1080_v42 = vpop.f32.mrf.mxu0  ;;  %v1149_v45 = vpop.f32.mrf.mxu2  ;;  %2529 = vmatpush.msra.mxu3 %v2528_v36  ;;  %2492 = vmatpush.msra.mxu2 %v3977_v19 }
 0x131   : > { %v4002_v30 = vadd.f32 %v1039_v41, %v841_v6  ;;  %v1120_v46 = vadd.f32 %v1119_v32, %v1080_v42  ;;  %2454 = vmatpush.msra.mxu1 %v3948_v55  ;;  %v2294_v55 = vand.u32 4294901760, %v2293_v54 }
 0x132   : > { %v1179_v34 = vpop.f32.mrf.mxu3  ;;  %2535 = vmatpush.msra.mxu3 %v2534_v40 }
 0x133   : > { %v1150_v53 = vadd.f32 %v1149_v45, %v1120_v46  ;;  %2161 = vmatmul.f32.vlgmr.msra.gmra.mxu0 %v3916_v0  ;;  %v1123_v20 = vpop.f32.mrf.mxu1  ;;  %v2470_v0 = vsel %vm189_vm0, %v2263_v38, 0  ;;  %v2295_v2 = vsub.f32 %v2293_v54, %v2294_v55 }
 0x134   : > { %2423 = vmatpush.msra.mxu0 %v2325_v50  ;;  %v4019_v61 = vand.u32 4294901760, %v2470_v0 }
 0x135   : > { %v1180_v57 = vadd.f32 %v1179_v34, %v1150_v53  ;;  %2228 = vmatmul.f32.gmra.mxu2 %v3925_v35  ;;  %v2296_v9 = vand.u32 4294901760, %v2295_v2 }
 0x136   : > { %2197 = vmatmul.f32.gmra.mxu1 %v2097_v59  ;;  %2427 = vmatpush.msra.mxu0 %v2331_v4  ;;  %v2264_v4 = vld [vmem:[#allocation2 + $0x25] sm:$0xff] }
 0x137   : > { %2255 = vmatmul.f32.gmra.mxu3 %v3925_v35  ;;  %v4024_v35 = vsub.f32 %v2470_v0, %v4019_v61  ;;  %v2473_v8 = vsel %vm189_vm0, %v2264_v4, 0 }
 0x138   : > { %v1088_v43 = vpop.f32.mrf.mxu0  ;;  %v1154_v50 = vpop.f32.mrf.mxu2  ;;  %v4033_v14 = vand.u32 4294901760, %v2473_v8 }
 0x139   : > { %v1124_v60 = vadd.f32 %v1123_v20, %v1088_v43  ;;  %v2495_v13 = vand.u32 4294901760, %v4024_v35  ;;  %v2873_v43 = vld [vmem:[#allocation6 + $0xd0] sm:$0xff] }
 0x13a   : > { %v1185_v62 = vpop.f32.mrf.mxu3 }
 0x13b   : > { %v1155_v1 = vadd.f32 %v1154_v50, %v1124_v60  ;;  %2166 = vmatmul.f32.gmra.mxu0 %v3940_v47  ;;  %v1239_v59 = vpop.f32.mrf.mxu1  ;;  %v2496_v24 = vsub.f32 %v4024_v35, %v2495_v13  ;;  %v4085_v60 = vand.u32 4294901760, %v2873_v43 }
 0x13d   : > { %v1186_v6 = vadd.f32 %v1185_v62, %v1155_v1  ;;  %2366 = vmatmul.f32.vlgmr.msrb.gmra.mxu2 %v2293_v54  ;;  %v2497_v10 = vand.u32 4294901760, %v2496_v24  ;;  %v4090_v2 = vsub.f32 %v2873_v43, %v4085_v60 }
 0x13e   : > { %2336 = vmatmul.f32.vlgmr.msrb.gmra.mxu1 %v3998_v18  ;;  %2624 = vmatpush.msrb.mxu2 %v2526_v22  ;;  %v2731_v22 = vand.u32 4294901760, %v4041_v23 }
 0x13f   : > { %2396 = vmatmul.f32.vlgmr.msrb.gmra.mxu3 %v2294_v55  ;;  %2591 = vmatpush.msrb.mxu1 %v3970_v56 }
 0x140   : > { %v1212_v47 = vpop.f32.mrf.mxu0  ;;  %v1281_v63 = vpop.f32.mrf.mxu2  ;;  %2653 = vmatpush.msrb.mxu3 %v3970_v56  ;;  %2628 = vmatpush.msrb.mxu2 %v2532_v31 }
 0x141   : > { %v1213_v5 = vadd.f32 %v1212_v47, %v1180_v57  ;;  %2593 = vmatpush.msrb.mxu1 %v3977_v19  ;;  %v2874_v57 = vld [vmem:[#allocation6 + $0xd8] sm:$0xff] }
 0x142   : > { %v1320_v15 = vpop.f32.mrf.mxu3  ;;  %2655 = vmatpush.msrb.mxu3 %v3977_v19  ;;  %v4048_v19 = vsub.f32 %v2473_v8, %v4033_v14  ;;  %v4078_v0 = vand.u32 4294901760, %v2874_v57 }
 0x143   : > { %v1240_v16 = vadd.f32 %v1239_v59, %v1213_v5  ;;  %2297 = vmatmul.f32.vlgmr.msrb.gmra.mxu0 %v2296_v9  ;;  %v1321_v17 = vadd.f32 %v1320_v15, %v1281_v63  ;;  %v1243_v56 = vpop.f32.mrf.mxu1 }
 0x144   : > { %2561 = vmatpush.msrb.mxu0 %v3975_v11  ;;  %v2304_v11 = vand.u32 4294901760, %v2303_v7  ;;  %v2503_v32 = vand.u32 4294901760, %v4048_v19  ;;  %v4083_v50 = vsub.f32 %v2874_v57, %v4078_v0 }
 0x145   : > { %v1246_v44 = vadd.f32 %v1240_v16, %v3984_v21  ;;  %2371 = vmatmul.f32.gmra.mxu2 %v2301_v52  ;;  %v2732_v21 = vsub.f32 %v4041_v23, %v2731_v22 }
 0x146   : > { %2340 = vmatmul.f32.gmra.mxu1 %v4017_v58  ;;  %2564 = vmatpush.msrb.mxu0 %v3982_v25  ;;  %v4060_v25 = vsub.f32 %v2672_v26, %v4056_v29  ;;  %v2504_v45 = vsub.f32 %v4048_v19, %v2503_v32  ;;  %v2932_v59 = vand.u32 4294901760, %v4083_v50  ;;  %v2668_v26 = vld [vmem:[#allocation2 + $0xe] sm:$0xff] }
 0x147   : > { %2402 = vmatmul.f32.gmra.mxu3 %v2302_v12  ;;  %v2733_v40 = vand.u32 4294901760, %v2732_v21  ;;  %v2938_v12 = vand.u32 4294901760, %v4090_v2  ;;  %v2678_v21 = vsel %vm189_vm0, %v2668_v26, 0 }
 0x148   : > { %v1216_v27 = vpop.f32.mrf.mxu0  ;;  %v1289_v28 = vpop.f32.mrf.mxu2  ;;  %v2737_v41 = vand.u32 4294901760, %v4060_v25  ;;  %v2505_v20 = vand.u32 4294901760, %v2504_v45  ;;  %v2933_v9 = vsub.f32 %v4083_v50, %v2932_v59 }
 0x149   : > { %v1217_v31 = vadd.f32 %v1216_v27, %v1186_v6  ;;  %v2667_v6 = vld [vmem:[#allocation2 + $0x6] sm:$0xff]  ;;  %v2939_v15 = vsub.f32 %v4090_v2, %v2938_v12 }
 0x14a   : > { %v1324_v33 = vpop.f32.mrf.mxu3  ;;  %v2738_v46 = vsub.f32 %v4060_v25, %v2737_v41  ;;  %v2675_v5 = vsel %vm189_vm0, %v2667_v6, 0  ;;  %v2934_v48 = vand.u32 4294901760, %v2933_v9 }
 0x14b   : > { %v1244_v36 = vadd.f32 %v1243_v56, %v1217_v31  ;;  %2305 = vmatmul.f32.gmra.mxu0 %v2304_v11  ;;  %v1325_v37 = vadd.f32 %v1324_v33, %v1289_v28  ;;  %v1380_v39 = vpop.f32.mrf.mxu1 }
 0x14d   : > { %v1247_v42 = vadd.f32 %v1244_v36, %v4002_v30  ;;  %2498 = vmatmul.f32.vlgmr.msra.gmra.mxu2 %v2497_v10  ;;  %v2739_v30 = vand.u32 4294901760, %v2738_v46  ;;  %v4125_v10 = vand.u32 4294901760, %v2678_v21 }
 0x14e   : > { %2456 = vmatmul.f32.vlgmr.msra.gmra.mxu1 %v3998_v18  ;;  %2766 = vmatpush.msra.mxu2 %v4041_v23 }
 0x14f   : > { %2537 = vmatmul.f32.vlgmr.msra.gmra.mxu3 %v4019_v61  ;;  %2734 = vmatpush.msra.mxu1 %v2733_v40 }
 0x150   : > { %v1350_v51 = vpop.f32.mrf.mxu0  ;;  %v1413_v34 = vpop.f32.mrf.mxu2  ;;  %2796 = vmatpush.msra.mxu3 %v4037_v3  ;;  %2769 = vmatpush.msra.mxu2 %v4060_v25  ;;  %v2707_v25 = vsub.f32 %v2678_v21, %v4125_v10 }
 0x151   : > { %v1351_v53 = vadd.f32 %v1350_v51, %v1321_v17  ;;  %2740 = vmatpush.msra.mxu1 %v2739_v30  ;;  %v2940_v17 = vand.u32 4294901760, %v2939_v15 }
 0x152   : > { %v1440_v54 = vpop.f32.mrf.mxu3  ;;  %2798 = vmatpush.msra.mxu3 %v4056_v29  ;;  %v2708_v51 = vand.u32 4294901760, %v2707_v25 }
 0x153   : > { %v1381_v38 = vadd.f32 %v1380_v39, %v1351_v53  ;;  %2429 = vmatmul.f32.vlgmr.msra.gmra.mxu0 %v3998_v18  ;;  %v1386_v49 = vpop.f32.mrf.mxu1 }
 0x154   : > { %2695 = vmatpush.msra.mxu0 %v4037_v3 }
 0x155   : > { %v1414_v55 = vadd.f32 %v1413_v34, %v1381_v38  ;;  %2506 = vmatmul.f32.gmra.mxu2 %v2505_v20 }
 0x156   : > { %2460 = vmatmul.f32.gmra.mxu1 %v4017_v58  ;;  %2697 = vmatpush.msra.mxu0 %v4056_v29 }
 0x157   : > { %v1441_v62 = vadd.f32 %v1440_v54, %v1414_v55  ;;  %2541 = vmatmul.f32.gmra.mxu3 %v4033_v14  ;;  %v2709_v55 = vsub.f32 %v2707_v25, %v2708_v51 }
 0x158   : > { %v1355_v18 = vpop.f32.mrf.mxu0  ;;  %v1417_v1 = vpop.f32.mrf.mxu2 }
 0x159   : > { %v4092_v52 = vadd.f32 %v1441_v62, %v1246_v44  ;;  %v1356_v4 = vadd.f32 %v1355_v18, %v1325_v37 }
 0x15a   : > { %v1444_v8 = vpop.f32.mrf.mxu3 }
 0x15b   : > { %v1387_v47 = vadd.f32 %v1386_v49, %v1356_v4  ;;  %2433 = vmatmul.f32.gmra.mxu0 %v4017_v58  ;;  %v1525_v63 = vpop.f32.mrf.mxu1  ;;  %v4106_v58 = vand.u32 4294901760, %v2675_v5 }
 0x15d   : > { %v1418_v16 = vadd.f32 %v1417_v1, %v1387_v47  ;;  %2630 = vmatmul.f32.vlgmr.msrb.gmra.mxu2 %v4019_v61  ;;  %v2699_v28 = vsub.f32 %v2675_v5, %v4106_v58 }
 0x15e   : > { %2597 = vmatmul.f32.vlgmr.msrb.gmra.mxu1 %v2495_v13  ;;  %2896 = vmatpush.msrb.mxu2 %v4078_v0 }
 0x15f   : > { %v1445_v56 = vadd.f32 %v1444_v8, %v1418_v16  ;;  %2657 = vmatmul.f32.vlgmr.msrb.gmra.mxu3 %v4019_v61  ;;  %2858 = vmatpush.msrb.mxu1 %v4037_v3  ;;  %v2669_v3 = vld [vmem:[#allocation2 + $0x1e] sm:$0xff] }
 0x160   : > { %v1486_v7 = vpop.f32.mrf.mxu0  ;;  %v1555_v44 = vpop.f32.mrf.mxu2  ;;  %2935 = vmatpush.msrb.mxu3 %v2934_v48  ;;  %2898 = vmatpush.msrb.mxu2 %v4085_v60 }
 0x161   : > { %v4110_v24 = vadd.f32 %v1445_v56, %v1247_v42  ;;  %v1526_v11 = vadd.f32 %v1525_v63, %v1486_v7  ;;  %2860 = vmatpush.msrb.mxu1 %v4056_v29  ;;  %v2700_v29 = vand.u32 4294901760, %v2699_v28 }
 0x162   : > { %v1585_v13 = vpop.f32.mrf.mxu3  ;;  %2941 = vmatpush.msrb.mxu3 %v2940_v17 }
 0x163   : > { %v1556_v27 = vadd.f32 %v1555_v44, %v1526_v11  ;;  %2567 = vmatmul.f32.vlgmr.msrb.gmra.mxu0 %v4024_v35  ;;  %v1529_v61 = vpop.f32.mrf.mxu1  ;;  %v2876_v35 = vsel %vm189_vm0, %v2669_v3, 0  ;;  %v2701_v40 = vsub.f32 %v2699_v28, %v2700_v29 }
 0x164   : > { %2829 = vmatpush.msrb.mxu0 %v2731_v22  ;;  %v4127_v36 = vand.u32 4294901760, %v2876_v35 }
 0x165   : > { %v1586_v31 = vadd.f32 %v1585_v13, %v1556_v27  ;;  %2634 = vmatmul.f32.gmra.mxu2 %v4033_v14  ;;  %v2702_v46 = vand.u32 4294901760, %v2701_v40 }
 0x166   : > { %2603 = vmatmul.f32.gmra.mxu1 %v2503_v32  ;;  %2833 = vmatpush.msrb.mxu0 %v2737_v41  ;;  %v2670_v41 = vld [vmem:[#allocation2 + $0x26] sm:$0xff] }
 0x167   : > { %2661 = vmatmul.f32.gmra.mxu3 %v4033_v14  ;;  %v4132_v14 = vsub.f32 %v2876_v35, %v4127_v36  ;;  %v2879_v45 = vsel %vm189_vm0, %v2670_v41, 0 }
 0x168   : > { %v1494_v23 = vpop.f32.mrf.mxu0  ;;  %v1560_v22 = vpop.f32.mrf.mxu2  ;;  %v4141_v20 = vand.u32 4294901760, %v2879_v45 }
 0x169   : > { %v1530_v33 = vadd.f32 %v1529_v61, %v1494_v23  ;;  %v2901_v53 = vand.u32 4294901760, %v4132_v14 }
 0x16a   : > { %v1591_v37 = vpop.f32.mrf.mxu3  ;;  %v4149_v62 = vsub.f32 %v2879_v45, %v4141_v20 }
 0x16b   : > { %v1561_v39 = vadd.f32 %v1560_v22, %v1530_v33  ;;  %2572 = vmatmul.f32.gmra.mxu0 %v4048_v19  ;;  %v1645_v32 = vpop.f32.mrf.mxu1  ;;  %v2902_v43 = vsub.f32 %v4132_v14, %v2901_v53 }
 0x16d   : > { %v1592_v42 = vadd.f32 %v1591_v37, %v1561_v39  ;;  %2772 = vmatmul.f32.vlgmr.msra.gmra.mxu2 %v2699_v28  ;;  %v2903_v4 = vand.u32 4294901760, %v2902_v43 }
 0x16e   : > { %2742 = vmatmul.f32.vlgmr.msra.gmra.mxu1 %v4106_v58  ;;  %3030 = vmatpush.msra.mxu2 %v2932_v59 }
 0x16f   : > { %2802 = vmatmul.f32.vlgmr.msra.gmra.mxu3 %v2700_v29  ;;  %2997 = vmatpush.msra.mxu1 %v4078_v0 }
 0x170   : > { %v1618_v19 = vpop.f32.mrf.mxu0  ;;  %v1687_v34 = vpop.f32.mrf.mxu2  ;;  %3059 = vmatpush.msra.mxu3 %v4078_v0  ;;  %3034 = vmatpush.msra.mxu2 %v2938_v12 }
 0x171   : > { %v1619_v30 = vadd.f32 %v1618_v19, %v1586_v31  ;;  %2999 = vmatpush.msra.mxu1 %v4085_v60 }
 0x172   : > { %v1726_v54 = vpop.f32.mrf.mxu3  ;;  %3061 = vmatpush.msra.mxu3 %v4085_v60  ;;  %v2710_v60 = vand.u32 4294901760, %v2709_v55 }
 0x173   : > { %v1646_v38 = vadd.f32 %v1645_v32, %v1619_v30  ;;  %2703 = vmatmul.f32.vlgmr.msra.gmra.mxu0 %v2702_v46  ;;  %v1727_v49 = vadd.f32 %v1726_v54, %v1687_v34  ;;  %v1649_v57 = vpop.f32.mrf.mxu1 }
 0x174   : > { %2967 = vmatpush.msra.mxu0 %v4083_v50  ;;  %v2909_v50 = vand.u32 4294901760, %v4149_v62 }
 0x175   : > { %v1652_v0 = vadd.f32 %v1646_v38, %v4092_v52  ;;  %2777 = vmatmul.f32.gmra.mxu2 %v2707_v25 }
 0x176   : > { %2746 = vmatmul.f32.gmra.mxu1 %v4125_v10  ;;  %2970 = vmatpush.msra.mxu0 %v4090_v2  ;;  %v2910_v47 = vsub.f32 %v4149_v62, %v2909_v50 }
 0x177   : > { %2808 = vmatmul.f32.gmra.mxu3 %v2708_v51 }
 0x178   : > { %v1622_v18 = vpop.f32.mrf.mxu0  ;;  %v1695_v1 = vpop.f32.mrf.mxu2  ;;  %v2911_v48 = vand.u32 4294901760, %v2910_v47 }
 0x179   : > { %v1623_v59 = vadd.f32 %v1622_v18, %v1592_v42 }
 0x17a   : > { %v1730_v6 = vpop.f32.mrf.mxu3 }
 0x17b   : > { %v1650_v52 = vadd.f32 %v1649_v57, %v1623_v59  ;;  %2711 = vmatmul.f32.gmra.mxu0 %v2710_v60  ;;  %v1731_v8 = vadd.f32 %v1730_v6, %v1695_v1  ;;  %v1786_v9 = vpop.f32.mrf.mxu1 }
 0x17d   : > { %v1653_v12 = vadd.f32 %v1650_v52, %v4110_v24  ;;  %2904 = vmatmul.f32.vlgmr.msrb.gmra.mxu2 %v2903_v4 }
 0x17e   : > { %2862 = vmatmul.f32.vlgmr.msrb.gmra.mxu1 %v4106_v58 }
 0x17f   : > { %2943 = vmatmul.f32.vlgmr.msrb.gmra.mxu3 %v4127_v36 }
 0x180   : > { %v1756_v2 = vpop.f32.mrf.mxu0  ;;  %v1819_v63 = vpop.f32.mrf.mxu2 }
 0x181   : > { %v1757_v5 = vadd.f32 %v1756_v2, %v1727_v49 }
 0x182   : > { %v1846_v15 = vpop.f32.mrf.mxu3 }
 0x183   : > { %v1787_v16 = vadd.f32 %v1786_v9, %v1757_v5  ;;  %2835 = vmatmul.f32.vlgmr.msrb.gmra.mxu0 %v4106_v58  ;;  %v1792_v17 = vpop.f32.mrf.mxu1 }
 0x185   : > { %v1820_v56 = vadd.f32 %v1819_v63, %v1787_v16  ;;  %2912 = vmatmul.f32.gmra.mxu2 %v2911_v48 }
 0x186   : > { %2866 = vmatmul.f32.gmra.mxu1 %v4125_v10 }
 0x187   : > { %v1847_v7 = vadd.f32 %v1846_v15, %v1820_v56  ;;  %2947 = vmatmul.f32.gmra.mxu3 %v4141_v20 }
 0x188   : > { %v1761_v44 = vpop.f32.mrf.mxu0  ;;  %v1823_v24 = vpop.f32.mrf.mxu2 }
 0x189   : > { %v1853_v11 = vadd.f32 %v1847_v7, %v1652_v0  ;;  %v1762_v26 = vadd.f32 %v1761_v44, %v1731_v8 }
 0x18a   : > { %v1850_v13 = vpop.f32.mrf.mxu3 }
 0x18b   : > { %v1793_v27 = vadd.f32 %v1792_v17, %v1762_v26  ;;  %2839 = vmatmul.f32.gmra.mxu0 %v4125_v10  ;;  %v1931_v61 = vpop.f32.mrf.mxu1 }
 0x18d   : > { %v1824_v28 = vadd.f32 %v1823_v24, %v1793_v27  ;;  %3036 = vmatmul.f32.vlgmr.msra.gmra.mxu2 %v4127_v36 }
 0x18e   : > { %3003 = vmatmul.f32.vlgmr.msra.gmra.mxu1 %v2901_v53 }
 0x18f   : > { %v1851_v58 = vadd.f32 %v1850_v13, %v1824_v28  ;;  %3063 = vmatmul.f32.vlgmr.msra.gmra.mxu3 %v4127_v36 }
 0x190   : > { %v1892_v3 = vpop.f32.mrf.mxu0  ;;  %v1961_v21 = vpop.f32.mrf.mxu2 }
 0x191   : > { %v1854_v31 = vadd.f32 %v1851_v58, %v1653_v12  ;;  %v1932_v35 = vadd.f32 %v1931_v61, %v1892_v3 }
 0x192   : > { %v1991_v29 = vpop.f32.mrf.mxu3 }
 0x193   : > { %v1962_v23 = vadd.f32 %v1961_v21, %v1932_v35  ;;  %2973 = vmatmul.f32.vlgmr.msra.gmra.mxu0 %v4132_v14  ;;  %v1935_v22 = vpop.f32.mrf.mxu1 }
 0x195   : > { %v1992_v33 = vadd.f32 %v1991_v29, %v1962_v23  ;;  %3040 = vmatmul.f32.gmra.mxu2 %v4141_v20 }
 0x196   : > { %3009 = vmatmul.f32.gmra.mxu1 %v2909_v50 }
 0x197   : > { %3067 = vmatmul.f32.gmra.mxu3 %v4141_v20 }
 0x198   : > { %v1900_v10 = vpop.f32.mrf.mxu0  ;;  %v1966_v37 = vpop.f32.mrf.mxu2 }
 0x199   : > { %v1936_v39 = vadd.f32 %v1935_v22, %v1900_v10 }
 0x19a   : > { %v1997_v32 = vpop.f32.mrf.mxu3 }
 0x19b   : > { %v1967_v36 = vadd.f32 %v1966_v37, %v1936_v39  ;;  %2978 = vmatmul.f32.gmra.mxu0 %v4149_v62  ;;  %v2051_v40 = vpop.f32.mrf.mxu1 }
 0x19d   : > { %v1998_v25 = vadd.f32 %v1997_v32, %v1967_v36 }
 0x1a0   : > { %v2024_v41 = vpop.f32.mrf.mxu0  ;;  %v2093_v42 = vpop.f32.mrf.mxu2 }
 0x1a1   : > { %v2025_v45 = vadd.f32 %v2024_v41, %v1992_v33 }
 0x1a2   : > { %v2132_v14 = vpop.f32.mrf.mxu3 }
 0x1a3   : > { %v2052_v46 = vadd.f32 %v2051_v40, %v2025_v45  ;;  %v2133_v51 = vadd.f32 %v2132_v14, %v2093_v42  ;;  %v2055_v19 = vpop.f32.mrf.mxu1 }
 0x1a5   : > { %v2058_v34 = vadd.f32 %v2052_v46, %v1853_v11 }
 0x1a8   : > { %v2028_v30 = vpop.f32.mrf.mxu0  ;;  %v2101_v53 = vpop.f32.mrf.mxu2 }
 0x1a9   : > { %v2029_v20 = vadd.f32 %v2028_v30, %v1998_v25 }
 0x1aa   : > { %v2136_v54 = vpop.f32.mrf.mxu3 }
 0x1ab   : > { %v2056_v38 = vadd.f32 %v2055_v19, %v2029_v20  ;;  %v2137_v49 = vadd.f32 %v2136_v54, %v2101_v53  ;;  %v2192_v57 = vpop.f32.mrf.mxu1 }
 0x1ad   : > { %v2059_v55 = vadd.f32 %v2056_v38, %v1854_v31 }
 0x1b0   : > { %v2162_v0 = vpop.f32.mrf.mxu0  ;;  %v2225_v43 = vpop.f32.mrf.mxu2 }
 0x1b1   : > { %v2163_v62 = vadd.f32 %v2162_v0, %v2133_v51 }
 0x1b2   : > { %v2252_v60 = vpop.f32.mrf.mxu3 }
 0x1b3   : > { %v2193_v18 = vadd.f32 %v2192_v57, %v2163_v62  ;;  %v2198_v1 = vpop.f32.mrf.mxu1 }
 0x1b5   : > { %v2226_v59 = vadd.f32 %v2225_v43, %v2193_v18 }
 0x1b7   : > { %v2253_v4 = vadd.f32 %v2252_v60, %v2226_v59 }
 0x1b8   : > { %v2167_v50 = vpop.f32.mrf.mxu0  ;;  %v2229_v6 = vpop.f32.mrf.mxu2 }
 0x1b9   : > { %v2259_v52 = vadd.f32 %v2253_v4, %v2058_v34  ;;  %v2168_v8 = vadd.f32 %v2167_v50, %v2137_v49 }
 0x1ba   : > { %v2256_v9 = vpop.f32.mrf.mxu3 }
 0x1bb   : > { %v2199_v12 = vadd.f32 %v2198_v1, %v2168_v8  ;;  %v2337_v47 = vpop.f32.mrf.mxu1 }
 0x1bd   : > { %v2230_v2 = vadd.f32 %v2229_v6, %v2199_v12 }
 0x1bf   : > { %v2257_v63 = vadd.f32 %v2256_v9, %v2230_v2 }
 0x1c0   : > { %v2298_v5 = vpop.f32.mrf.mxu0  ;;  %v2367_v48 = vpop.f32.mrf.mxu2 }
 0x1c1   : > { %v2260_v15 = vadd.f32 %v2257_v63, %v2059_v55  ;;  %v2338_v16 = vadd.f32 %v2337_v47, %v2298_v5 }
 0x1c2   : > { %v2397_v17 = vpop.f32.mrf.mxu3 }
 0x1c3   : > { %v2368_v56 = vadd.f32 %v2367_v48, %v2338_v16  ;;  %v2341_v7 = vpop.f32.mrf.mxu1 }
 0x1c5   : > { %v2398_v44 = vadd.f32 %v2397_v17, %v2368_v56 }
 0x1c8   : > { %v2306_v24 = vpop.f32.mrf.mxu0  ;;  %v2372_v11 = vpop.f32.mrf.mxu2 }
 0x1c9   : > { %v2342_v26 = vadd.f32 %v2341_v7, %v2306_v24 }
 0x1ca   : > { %v2403_v13 = vpop.f32.mrf.mxu3 }
 0x1cb   : > { %v2373_v27 = vadd.f32 %v2372_v11, %v2342_v26  ;;  %v2457_v61 = vpop.f32.mrf.mxu1 }
 0x1cd   : > { %v2404_v28 = vadd.f32 %v2403_v13, %v2373_v27 }
 0x1d0   : > { %v2430_v58 = vpop.f32.mrf.mxu0  ;;  %v2499_v3 = vpop.f32.mrf.mxu2 }
 0x1d1   : > { %v2431_v21 = vadd.f32 %v2430_v58, %v2398_v44 }
 0x1d2   : > { %v2538_v31 = vpop.f32.mrf.mxu3 }
 0x1d3   : > { %v2458_v35 = vadd.f32 %v2457_v61, %v2431_v21  ;;  %v2461_v29 = vpop.f32.mrf.mxu1  ;;  %v2539_v43 = vadd.f32 %v2538_v31, %v2499_v3 }
 0x1d5   : > { %v2464_v23 = vadd.f32 %v2458_v35, %v2259_v52 }
 0x1d8   : > { %v2434_v22 = vpop.f32.mrf.mxu0  ;;  %v2507_v33 = vpop.f32.mrf.mxu2 }
 0x1d9   : > { %v2435_v10 = vadd.f32 %v2434_v22, %v2404_v28 }
 0x1da   : > { %v2542_v37 = vpop.f32.mrf.mxu3 }
 0x1db   : > { %v2462_v39 = vadd.f32 %v2461_v29, %v2435_v10  ;;  %v2598_v32 = vpop.f32.mrf.mxu1  ;;  %v2543_v52 = vadd.f32 %v2542_v37, %v2507_v33 }
 0x1dd   : > { %v4168_v36 = vadd.f32 %v2462_v39, %v2260_v15 }
 0x1e0   : > { %v2568_v40 = vpop.f32.mrf.mxu0  ;;  %v2631_v25 = vpop.f32.mrf.mxu2 }
 0x1e1   : > { %v2569_v60 = vadd.f32 %v2568_v40, %v2539_v43 }
 0x1e2   : > { %v2658_v41 = vpop.f32.mrf.mxu3 }
 0x1e3   : > { %v2604_v42 = vpop.f32.mrf.mxu1  ;;  %v2599_v4 = vadd.f32 %v2598_v32, %v2569_v60 }
 0x1e5   : > { %v2632_v8 = vadd.f32 %v2631_v25, %v2599_v4 }
 0x1e7   : > { %v2659_v16 = vadd.f32 %v2658_v41, %v2632_v8 }
 0x1e8   : > { %v2573_v45 = vpop.f32.mrf.mxu0  ;;  %v2635_v14 = vpop.f32.mrf.mxu2 }
 0x1e9   : > { %v2574_v9 = vadd.f32 %v2573_v45, %v2543_v52  ;;  %v2665_v26 = vadd.f32 %v2659_v16, %v2464_v23 }
 0x1ea   : > { %v2662_v46 = vpop.f32.mrf.mxu3 }
 0x1eb   : > { %v2743_v51 = vpop.f32.mrf.mxu1  ;;  %v2605_v17 = vadd.f32 %v2604_v42, %v2574_v9 }
 0x1ed   : > { %v2636_v13 = vadd.f32 %v2635_v14, %v2605_v17 }
 0x1ef   : > { %v2663_v29 = vadd.f32 %v2662_v46, %v2636_v13 }
 0x1f0   : > { %v2704_v19 = vpop.f32.mrf.mxu0  ;;  %v2773_v34 = vpop.f32.mrf.mxu2 }
 0x1f1   : > { %v2744_v18 = vadd.f32 %v2743_v51, %v2704_v19  ;;  %v2666_v25 = vadd.f32 %v2663_v29, %v4168_v36 }
 0x1f2   : > { %v2803_v30 = vpop.f32.mrf.mxu3 }
 0x1f3   : > { %v2747_v53 = vpop.f32.mrf.mxu1  ;;  %v2774_v50 = vadd.f32 %v2773_v34, %v2744_v18 }
 0x1f5   : > { %v2804_v12 = vadd.f32 %v2803_v30, %v2774_v50 }
 0x1f8   : > { %v2712_v20 = vpop.f32.mrf.mxu0  ;;  %v2778_v54 = vpop.f32.mrf.mxu2 }
 0x1f9   : > { %v2748_v47 = vadd.f32 %v2747_v53, %v2712_v20 }
 0x1fa   : > { %v2809_v38 = vpop.f32.mrf.mxu3 }
 0x1fb   : > { %v2863_v49 = vpop.f32.mrf.mxu1  ;;  %v2779_v56 = vadd.f32 %v2778_v54, %v2748_v47 }
 0x1fd   : > { %v2810_v27 = vadd.f32 %v2809_v38, %v2779_v56 }
 0x200   : > { %v2836_v57 = vpop.f32.mrf.mxu0  ;;  %v2905_v55 = vpop.f32.mrf.mxu2 }
 0x201   : > { %v2837_v63 = vadd.f32 %v2836_v57, %v2804_v12 }
 0x202   : > { %v2944_v0 = vpop.f32.mrf.mxu3 }
 0x203   : > { %v2867_v62 = vpop.f32.mrf.mxu1  ;;  %v2945_v5 = vadd.f32 %v2944_v0, %v2905_v55  ;;  %v2864_v24 = vadd.f32 %v2863_v49, %v2837_v63 }
 0x205   : > { %v2870_v28 = vadd.f32 %v2864_v24, %v2665_v26 }
 0x208   : > { %v2840_v1 = vpop.f32.mrf.mxu0  ;;  %v2913_v59 = vpop.f32.mrf.mxu2 }
 0x209   : > { %v2841_v58 = vadd.f32 %v2840_v1, %v2810_v27 }
 0x20a   : > { %v2948_v6 = vpop.f32.mrf.mxu3 }
 0x20b   : > { %v3004_v2 = vpop.f32.mrf.mxu1  ;;  %v2949_v3 = vadd.f32 %v2948_v6, %v2913_v59  ;;  %v2868_v37 = vadd.f32 %v2867_v62, %v2841_v58 }
 0x20d   : > { %v2871_v42 = vadd.f32 %v2868_v37, %v2666_v25 }
 0x210   : > { %v2974_v48 = vpop.f32.mrf.mxu0  ;;  %v3037_v15 = vpop.f32.mrf.mxu2 }
 0x211   : > { %v2975_v7 = vadd.f32 %v2974_v48, %v2945_v5 }
 0x212   : > { %v3064_v44 = vpop.f32.mrf.mxu3 }
 0x213   : > { %v3005_v11 = vadd.f32 %v3004_v2, %v2975_v7  ;;  %v3010_v35 = vpop.f32.mrf.mxu1 }
 0x215   : > { %v3038_v61 = vadd.f32 %v3037_v15, %v3005_v11 }
 0x217   : > { %v3065_v21 = vadd.f32 %v3064_v44, %v3038_v61 }
 0x218   : > { %v2979_v31 = vpop.f32.mrf.mxu0  ;;  %v3041_v10 = vpop.f32.mrf.mxu2 }
 0x219   : > { %v3071_v22 = vadd.f32 %v3065_v21, %v2870_v28  ;;  %v2980_v33 = vadd.f32 %v2979_v31, %v2949_v3 }
 0x21a   : > { %v3068_v40 = vpop.f32.mrf.mxu3 }
 0x21b   : > { %v3073_v39 = vsub.f32 0.0, %v3071_v22  ;;  %v3011_v32 = vadd.f32 %v3010_v35, %v2980_v33 }
 0x21d   : > { %v3075_v23 = vmul.f32 1.442695, %v3073_v39  ;;  %v3042_v41 = vadd.f32 %v3041_v10, %v3011_v32 }
 0x21f   : > { %3291 = vpow2.f32 %v3075_v23  ;;  %v3069_v45 = vadd.f32 %v3068_v40, %v3042_v41 }
 0x221   : > { %v3072_v14 = vadd.f32 %v3069_v45, %v2871_v42 }
 0x223   : > { %v3074_v51 = vsub.f32 0.0, %v3072_v14 }
 0x225   : > { %v3292_v19 = vpop.eup %3291  ;;  %v3077_v34 = vmul.f32 1.442695, %v3074_v51 }
 0x226   : > { %v3079_v46 = vadd.f32 1.0, %v3292_v19 }
 0x227   : > { %3293 = vpow2.f32 %v3077_v34 }
 0x228   : > { %3295 = vrcp.f32 %v3079_v46  ;;  %v3092_v36 = vand.u32 2147483648, %v3079_v46  ;;  %v3090_v57 = vand.u32 2147483647, %v3079_v46  ;;  %vm3086_vm3 = vweird.f32 %v3079_v46 }
 0x22a   : > { %v3093_v43 = vor.u32 1.1754944e-38, %v3092_v36  ;;  %vm3091_vm5 = vcmp.eq.f32.partialorder %v3090_v57, 8.507059e+37 }
 0x22d   : > { %v3294_v30 = vpop.eup %3293 }
 0x22e   : > { %v3296_v53 = vpop.eup %3295  ;;  %v3080_v20 = vadd.f32 1.0, %v3294_v30 }
 0x22f   : > { %v3082_v54 = vmul.f32 %v3296_v53, %v3079_v46  ;;  %vm3087_vm2 = vweird.f32 %v3296_v53 }
 0x230   : > { %3297 = vrcp.f32 %v3080_v20  ;;  %vm3088_vm4 = vmor %vm3086_vm3, %vm3087_vm2  ;;  %v3106_v59 = vand.u32 2147483648, %v3080_v20  ;;  %v3104_v50 = vand.u32 2147483647, %v3080_v20  ;;  %vm3100_vm7 = vweird.f32 %v3080_v20 }
 0x231   : > { %v3083_v38 = vsub.f32 1.0, %v3082_v54 }
 0x232   : > { %v3107_v52 = vor.u32 1.1754944e-38, %v3106_v59  ;;  %vm3105_vm9 = vcmp.eq.f32.partialorder %v3104_v50, 8.507059e+37 }
 0x233   : > { %v3084_v49 = vmul.f32 %v3296_v53, %v3083_v38 }
 0x235   : > { %v3085_v55 = vadd.f32 %v3296_v53, %v3084_v49 }
 0x236   : > { %v3298_v0 = vpop.eup %3297 }
 0x237   : > { %v3096_v62 = vmul.f32 %v3298_v0, %v3080_v20  ;;  %v3089_v60 = vsel %vm3088_vm4, %v3296_v53, %v3085_v55  ;;  %vm3101_vm6 = vweird.f32 %v3298_v0 }
 0x238   : > { %v3094_v18 = vsel %vm3091_vm5, %v3093_v43, %v3089_v60  ;;  %vm3102_vm8 = vmor %vm3100_vm7, %vm3101_vm6 }
 0x239   : > { %v3097_v1 = vsub.f32 1.0, %v3096_v62  ;;  %3109 = vst.msk [vmem:[%s3583_s15] sm:$0xff] %vm189_vm0, %v3094_v18 }
 0x23b   : > { %v3098_v4 = vmul.f32 %v3298_v0, %v3097_v1 }
 0x23d   : > { %v3099_v6 = vadd.f32 %v3298_v0, %v3098_v4 }
 0x23f   : > { %v3103_v8 = vsel %vm3102_vm8, %v3298_v0, %v3099_v6 }
 0x240   : > { %v3108_v9 = vsel %vm3105_vm9, %v3107_v52, %v3103_v8 }
 0x241   : > { %3110 = vst.msk [vmem:[%s3583_s15 + $0x8] sm:$0xff] %vm189_vm0, %v3108_v9 }
 0x242   : > { %3386 = shalt.err (!%p3383_p13)
}
 0x243   : > { %s3435_s30 = smov 128   ;;  %s3436_s6 = smov 8  }
 0x244   : > { %3235 = dma.vmem_to_hbm [thread:$0]  (%p3522_p5), %s3125_s13, 256, %s3127_s18, %s3112_s19, %s3435_s30, %s3435_s30, %s3436_s6  }
 0x245 PF: > { %s3141_s7 = sand.u32 1, %s3417_s9   ;;  %p4218_p0 = scmp.ge.s32.totalorder %s3429_s12, 2 }
 0x246   : > { %s3142_s14 = scalar_lea.sflag [#allocation5], %s3141_s7 }
 0x247   : > { %p3246_p3 = pnand %p4218_p0, %p3487_p6 }
 0x249   : > { %p3247_p7 = pneg %p3246_p3 }
 0x24b   : > { %3412 = dma.done.wait (%p3247_p7), %s3142_s14, 256  }
 0x24c   : > { %3414 = vsyncadd (%p3247_p7), %s3142_s14, 4294967040  ;;  %p16_p10 = scmp.ge.s32.totalorder %s3506_s23, 4   ;;  %s4219_s9 = smov %s3421_s10 }
 0x24d   : > { %s4220_s10 = smov %s3425_s11  ;;  %s4221_s11 = smov %s3518_s28 }
 0x24e   : > { %s4222_s12 = smov %s3506_s23  ;;  %18 = sbr.rel (!%p16_p10) target bundleno = 6 (0x6), region = 95 }
 0x253   :  { %3148 = vsyncpa [#allocation4], 1 }
 0x254   :  { %3150 = vsyncpa [#allocation4 + $0x1], 1 }
 0x255   :  { %3151 = vsyncpa [#allocation7], 1 }
 0x256   :  { %3152 = vsyncpa [#allocation5], 1 }
 0x257   :  { %3154 = vsyncpa [#allocation5 + $0x1], 1 }

</bundles_post_ra>
